<compile_context>
chip_gen: v7x
topology: tpu7x:2x2x1
jax: 0.10.0
libtpu: 0.0.40
codegen_flags: <defaults>
</compile_context>

<pallas_src>
import functools

import jax
import jax.numpy as jnp
from jax.experimental import pallas as pl
from jax.experimental.pallas import tpu as pltpu

LEAKY_SLOPE = 0.1
BN_EPS = 1e-5

CONFIG = [(32, 3, 1), (64, 3, 2), ['B', 1], (128, 3, 2), ['B', 2],
          (256, 3, 2), ['B', 8], (512, 3, 2), ['B', 8], (1024, 3, 2),
          ['B', 4], (512, 1, 1), (1024, 3, 1), 'S', (256, 1, 1), 'U',
          (256, 1, 1), (512, 3, 1), 'S', (128, 1, 1), 'U', (128, 1, 1),
          (256, 3, 1), 'S']


def _round_up(x, m):
    return ((x + m - 1) // m) * m


# ---------------------------------------------------------------------------
# Hardware detection: the 2-block split only helps 2-TensorCore parts (v7x,
# v4/v5p megacore); on v5e/v6e it is pure grid-step overhead.
# ---------------------------------------------------------------------------
def _detect_num_tensorcores():
    try:
        info = pltpu.get_tpu_info()
        for name in ("num_cores", "core_count", "num_tensorcores",
                     "tensor_core_count", "num_cores_per_chip"):
            v = getattr(info, name, None)
            if isinstance(v, int) and 1 <= v <= 8:
                return v
    except Exception:
        pass
    try:
        kind = jax.devices()[0].device_kind.lower()
        if ("v4" in kind) or ("v5p" in kind) or ("7" in kind):
            return 2
    except Exception:
        pass
    return 1


_NUM_TC = _detect_num_tensorcores()

# Per-buffer tile budgets (Pallas double-buffers on top of these); the
# resulting worst-case VMEM footprint (~10 MiB) fits every generation,
# including v7x's 64 MiB per TensorCore.
_B_TILE_BUDGET = 5 << 20      # bf16 weight tile
_A_TILE_BUDGET = 4 << 20      # bf16 activation tile
_O_TILE_BUDGET = 4 << 20      # output / f32 accumulator tile


# ---------------------------------------------------------------------------
# Tile selection
# ---------------------------------------------------------------------------
def _largest_tk(K_pad, TN):
    """Largest 128-multiple divisor of K_pad whose bf16 B tile fits budget."""
    units = K_pad // 128
    max_units = max(1, _B_TILE_BUDGET // (TN * 2 * 128))
    best = 1
    for d in range(1, units + 1):
        if units % d == 0 and d <= max_units:
            best = d
    return best * 128


def _pick_m_tiles(M, TK, TN, out_bytes):
    """Return (M_pad, TM): single full-M tile when it fits, padded fallback
    otherwise (never triggered at this workload, so no extra HBM pass)."""
    def fits(tm):
        return (tm * TK * 2 <= _A_TILE_BUDGET
                and tm * TN * max(out_bytes, 4) <= _O_TILE_BUDGET)

    if fits(M):
        return M, M                      # full-dim block is always legal
    TM = 512
    while TM > 16 and not fits(TM):
        TM //= 2
    return _round_up(M, TM), TM


# ---------------------------------------------------------------------------
# Pallas kernels: tiled matmul (bf16 in, f32 acc) + fused shift (+ LeakyReLU)
# ---------------------------------------------------------------------------
def _mm_kernel_single_k(a_ref, b_ref, shift_ref, o_ref, *, act):
    # Single reduction step: no f32 accumulator scratch round-trip.
    y = jnp.dot(a_ref[...], b_ref[...], preferred_element_type=jnp.float32)
    y = y + shift_ref[...]
    if act:
        y = jnp.maximum(y, LEAKY_SLOPE * y)
    o_ref[...] = y.astype(o_ref.dtype)


def _mm_kernel_multi_k(a_ref, b_ref, shift_ref, o_ref, acc_ref, *, act):
    @pl.when(pl.program_id(2) == 0)
    def _():
        acc_ref[...] = jnp.zeros_like(acc_ref)

    acc_ref[...] += jnp.dot(a_ref[...], b_ref[...],
                            preferred_element_type=jnp.float32)

    @pl.when(pl.program_id(2) == pl.num_programs(2) - 1)
    def _():
        y = acc_ref[...] + shift_ref[...]
        if act:
            y = jnp.maximum(y, LEAKY_SLOPE * y)
        o_ref[...] = y.astype(o_ref.dtype)


@functools.partial(jax.jit, static_argnames=("act", "out_dtype"))
def fused_matmul(a, b, shift, *, act, out_dtype):
    """(M,K_pad)bf16 @ (K_pad,N_pad)bf16 + shift[N_pad], optional LeakyReLU."""
    M, K_pad = a.shape
    _, N_pad = b.shape
    out_bytes = 2 if out_dtype == jnp.bfloat16 else 4

    # Fat, lane-dense tiles: fewest grid steps that stay inside VMEM budget.
    TN = min(N_pad, 512)
    TK = _largest_tk(K_pad, TN)
    M_pad, TM = _pick_m_tiles(M, TK, TN, out_bytes)

    # 2-TensorCore chips only: ensure >=2 parallel (i,j) blocks.  Prefer
    # splitting N (halves per-core weight traffic, keeps TN >= 256); fall back
    # to an M split for wide-M / narrow-N layers; tiny layers stay unsplit.
    if _NUM_TC >= 2 and (M_pad // TM) * (N_pad // TN) == 1:
        if N_pad >= 512:
            TN = N_pad // 2
        elif M_pad >= 64 and M_pad % 32 == 0:
            TM = M_pad // 2

    if M_pad != M:                       # fallback only; never hit here
        a = jnp.pad(a, ((0, M_pad - M), (0, 0)))

    gm, gn, gk = M_pad // TM, N_pad // TN, K_pad // TK

    cost = pl.CostEstimate(
        flops=2 * M_pad * N_pad * K_pad,
        transcendentals=0,
        bytes_accessed=(M_pad * K_pad * 2 + K_pad * N_pad * 2 + N_pad * 4
                        + M_pad * N_pad * out_bytes))

    vmem_bytes = (2 * 2 * (TM * TK + TK * TN) + 2 * TM * TN * out_bytes
                  + (TM * TN * 4 if gk > 1 else 0) + 2 * TN * 4)
    vmem_limit = int(min(40 << 20, max(16 << 20, 2 * vmem_bytes)))

    if gk == 1:
        out = pl.pallas_call(
            functools.partial(_mm_kernel_single_k, act=act),
            out_shape=jax.ShapeDtypeStruct((M_pad, N_pad), out_dtype),
            grid_spec=pltpu.PrefetchScalarGridSpec(
                num_scalar_prefetch=0,
                grid=(gm, gn),
                in_specs=[
                    pl.BlockSpec((TM, TK), lambda i, j: (i, 0)),
                    pl.BlockSpec((TK, TN), lambda i, j: (0, j)),
                    pl.BlockSpec((1, TN), lambda i, j: (0, j)),
                ],
                out_specs=pl.BlockSpec((TM, TN), lambda i, j: (i, j)),
            ),
            compiler_params=pltpu.CompilerParams(
                dimension_semantics=("parallel", "parallel"),
                vmem_limit_bytes=vmem_limit),
            cost_estimate=cost,
        )(a, b, shift)
    else:
        out = pl.pallas_call(
            functools.partial(_mm_kernel_multi_k, act=act),
            out_shape=jax.ShapeDtypeStruct((M_pad, N_pad), out_dtype),
            grid_spec=pltpu.PrefetchScalarGridSpec(
                num_scalar_prefetch=0,
                grid=(gm, gn, gk),
                in_specs=[
                    pl.BlockSpec((TM, TK), lambda i, j, k: (i, k)),
                    pl.BlockSpec((TK, TN), lambda i, j, k: (k, j)),
                    pl.BlockSpec((1, TN), lambda i, j, k: (0, j)),
                ],
                out_specs=pl.BlockSpec((TM, TN), lambda i, j, k: (i, j)),
                scratch_shapes=[pltpu.VMEM((TM, TN), jnp.float32)],
            ),
            compiler_params=pltpu.CompilerParams(
                dimension_semantics=("parallel", "parallel", "arbitrary"),
                vmem_limit_bytes=vmem_limit),
            cost_estimate=cost,
        )(a, b, shift)

    if M_pad != M:
        out = out[:M]
    return out


# ---------------------------------------------------------------------------
# Conv (im2col glue in plain JAX, bf16; hot matmul path in Pallas)
# ---------------------------------------------------------------------------
def conv2d_block(x, p):
    """x: (N, H, W, Cin) -> (N, Ho, Wo, Cout) with fused BN/bias + LeakyReLU."""
    KH, KW, Cin, Cout = p["kshape"]
    stride, padding, act = p["stride"], p["padding"], p["bn_act"]
    N, H, W, _ = x.shape

    x = x.astype(jnp.bfloat16)
    if padding:
        x = jnp.pad(x, ((0, 0), (padding, padding), (padding, padding), (0, 0)))
    Ho = (H + 2 * padding - KH) // stride + 1
    Wo = (W + 2 * padding - KW) // stride + 1

    # TODO(synk): fold these KHxKW taps into the reduction grid (direct conv)
    #             instead of materializing im2col in HBM.
    cols = [x[:, kh:kh + Ho * stride:stride, kw:kw + Wo * stride:stride, :]
            for kh in range(KH) for kw in range(KW)]
    K = KH * KW * Cin
    K_pad = p["K_pad"]
    if K_pad > K:
        # K-pad folded into the same concat (zero columns; contribute 0).
        cols.append(jnp.zeros((N, Ho, Wo, K_pad - K), jnp.bfloat16))
    a = (cols[0] if len(cols) == 1 else jnp.concatenate(cols, axis=-1))
    a = a.reshape(N * Ho * Wo, K_pad)

    out_dtype = jnp.bfloat16 if act else jnp.float32
    y = fused_matmul(a, p["w"], p["shift"], act=act, out_dtype=out_dtype)
    if p["N_pad"] != Cout:
        # TODO(synk): for Cout < 128 layers, propagate the channel padding
        #             into the next layer's weights instead of slicing here.
        y = y[:, :Cout]
    return y.reshape(N, Ho, Wo, Cout)


# ---------------------------------------------------------------------------
# Deterministic parameter construction (mirrors YOLOv3._create_conv_layers)
# ---------------------------------------------------------------------------
def init_cnn_block(key, in_c, out_c, kernel_size, stride, padding, bn_act=True):
    k_w, k_g, k_b, k_m, k_v, k_bias = jax.random.split(key, 6)
    fan_in = in_c * kernel_size * kernel_size
    std = 0.5 * (2.0 / fan_in) ** 0.5
    w = std * jax.random.normal(
        k_w, (kernel_size, kernel_size, in_c, out_c), jnp.float32)
    if bn_act:
        gamma = 1.0 + 0.1 * jax.random.normal(k_g, (out_c,), jnp.float32)
        beta = 0.05 * jax.random.normal(k_b, (out_c,), jnp.float32)
        mean = 0.05 * jax.random.normal(k_m, (out_c,), jnp.float32)
        var = 1.0 + 0.1 * jax.random.uniform(k_v, (out_c,), jnp.float32)
        scale = gamma / jnp.sqrt(var + BN_EPS)
        shift = beta - mean * scale
    else:
        scale = jnp.ones((out_c,), jnp.float32)
        shift = 0.05 * jax.random.normal(k_bias, (out_c,), jnp.float32)  # bias

    K = kernel_size * kernel_size * in_c
    K_pad = _round_up(K, 128)            # always 128-granular (no 512 rounding)
    N_pad = _round_up(out_c, 128)

    # Fold BN scale into the weight columns (static; zero runtime cost),
    # pre-pad and cast to bf16 so no per-call weight pad/reshape is needed.
    b = (w.reshape(K, out_c) * scale[None, :]).astype(jnp.bfloat16)
    b = jnp.pad(b, ((0, K_pad - K), (0, N_pad - out_c)))
    shift_p = jnp.pad(shift, (0, N_pad - out_c)).reshape(1, N_pad)

    return dict(w=b, shift=shift_p.astype(jnp.float32),
                kshape=(kernel_size, kernel_size, in_c, out_c),
                stride=stride, padding=padding, bn_act=bn_act,
                K_pad=K_pad, N_pad=N_pad)


def build_yolov3_params(key, in_channels=3, num_classes=2):
    layers = []
    c = in_channels
    state = {"key": key}

    def nk():
        state["key"], sub = jax.random.split(state["key"])
        return sub

    for module in CONFIG:
        if isinstance(module, tuple):
            out_c, k, s = module
            layers.append(("cnn", init_cnn_block(
                nk(), c, out_c, k, s, 1 if k == 3 else 0)))
            c = out_c
        elif isinstance(module, list):
            reps = module[1]
            blocks = []
            for _ in range(reps):
                b1 = init_cnn_block(nk(), c, c // 2, 1, 1, 0)
                b2 = init_cnn_block(nk(), c // 2, c, 3, 1, 1)
                blocks.append((b1, b2))
            layers.append(("res", dict(blocks=blocks, residual=True,
                                       num_repeats=reps)))
        elif module == 'S':
            b1 = init_cnn_block(nk(), c, c // 2, 1, 1, 0)
            b2 = init_cnn_block(nk(), c // 2, c, 3, 1, 1)
            layers.append(("res", dict(blocks=[(b1, b2)], residual=False,
                                       num_repeats=1)))
            layers.append(("cnn", init_cnn_block(nk(), c, c // 2, 1, 1, 0)))
            p1 = init_cnn_block(nk(), c // 2, c, 3, 1, 1)
            p2 = init_cnn_block(nk(), c, (num_classes + 5) * 3, 1, 1, 0,
                                bn_act=False)
            layers.append(("pred", dict(cnn1=p1, cnn2=p2,
                                        num_classes=num_classes)))
            c = c // 2
        elif module == 'U':
            layers.append(("up", None))
            c = c * 3
    return layers


# ---------------------------------------------------------------------------
# Forward pass (mirrors YOLOv3.forward)
# ---------------------------------------------------------------------------
def yolov3_forward(layers, x_nchw, num_classes):
    x = jnp.transpose(x_nchw, (0, 2, 3, 1))   # NCHW -> NHWC
    outputs = []
    routes = []
    # TODO(synk): fuse each residual 1x1->3x3 pair into one pallas_call to
    #             amortize launch/glue overhead on the tiny deep layers.
    for kind, p in layers:
        if kind == "pred":
            y = conv2d_block(x, p["cnn1"])
            y = conv2d_block(y, p["cnn2"])            # (N, H, W, 3*(nc+5)) f32
            N_, H_, W_, _ = y.shape
            y = y.reshape(N_, H_, W_, 3, num_classes + 5)
            y = jnp.transpose(y, (0, 3, 1, 2, 4))     # (N, 3, H, W, nc+5)
            outputs.append(y)
            continue
        if kind == "cnn":
            x = conv2d_block(x, p)
        elif kind == "res":
            for b1, b2 in p["blocks"]:
                y = conv2d_block(conv2d_block(x, b1), b2)
                x = y + x if p["residual"] else y
            if p["num_repeats"] == 8:
                routes.append(x)
        elif kind == "up":
            # nn.Upsample(scale_factor=2, mode='nearest') as one broadcast.
            N_, H_, W_, C_ = x.shape
            x = jnp.broadcast_to(x[:, :, None, :, None, :],
                                 (N_, H_, 2, W_, 2, C_))
            x = x.reshape(N_, 2 * H_, 2 * W_, C_)
            x = jnp.concatenate([x, routes.pop()], axis=-1)
    return outputs


if __name__ == "__main__":
    num_classes = 2
    in_channels = 3
    key = jax.random.PRNGKey(0)
    k_param, k_x = jax.random.split(key)

    layers = build_yolov3_params(k_param, in_channels, num_classes)
    # Smallest valid spatial size: 32 (five stride-2 convs). Input is NCHW
    # like the PyTorch module.
    x = jax.random.normal(k_x, (2, in_channels, 32, 32), jnp.float32)

    outs = yolov3_forward(layers, x, num_classes)
    outs = jax.block_until_ready(outs)

    expected = [(2, 3, 1, 1, num_classes + 5),
                (2, 3, 2, 2, num_classes + 5),
                (2, 3, 4, 4, num_classes + 5)]
    assert [tuple(o.shape) for o in outs] == expected, \
        [tuple(o.shape) for o in outs]
    assert all(bool(jnp.all(jnp.isfinite(o))) for o in outs)
    print("KERNEL_OK")
</pallas_src>

<mosaic_0001>
module attributes {stable_mosaic.version = 11 : i64} {
  func.func @_mm_kernel_single_k(%arg0: i32, %arg1: i32, %arg2: memref<2048x128xbf16, #tpu.memory_space<vmem>>, %arg3: memref<128x128xbf16, #tpu.memory_space<vmem>>, %arg4: memref<1x128xf32, #tpu.memory_space<vmem>>, %arg5: memref<2048x128xbf16, #tpu.memory_space<vmem>>) attributes {dimension_semantics = [#tpu.dimension_semantics<parallel>, #tpu.dimension_semantics<parallel>], iteration_bounds = array<i64: 1, 1>, scalar_prefetch = 0 : i64, scratch_operands = 0 : i64, tpu.core_type = #tpu.core_type<tc>, window_params = [{transform_indices = @transform_0, window_bounds = array<i64: 2048, 128>}, {transform_indices = @transform_1, window_bounds = array<i64: 128, 128>}, {transform_indices = @transform_2, window_bounds = array<i64: 1, 128>}, {transform_indices = @transform_3, window_bounds = array<i64: 2048, 128>}]} {
    %c0 = arith.constant 0 : index
    %c0_0 = arith.constant 0 : index
    %0 = vector.load %arg2[%c0, %c0_0] : memref<2048x128xbf16, #tpu.memory_space<vmem>>, vector<2048x128xbf16>
    %c0_1 = arith.constant 0 : index
    %c0_2 = arith.constant 0 : index
    %1 = vector.load %arg3[%c0_1, %c0_2] : memref<128x128xbf16, #tpu.memory_space<vmem>>, vector<128x128xbf16>
    %cst = arith.constant dense<0.000000e+00> : vector<2048x128xf32>
    %2 = tpu.matmul %0, %1, %cst {dimension_numbers = #tpu.dot_dimension_numbers<[1], [0], [0], [1], [0, 0, 1, 1], [], []>} : vector<2048x128xbf16>, vector<128x128xbf16>, vector<2048x128xf32> -> vector<2048x128xf32>
    %c0_3 = arith.constant 0 : index
    %c0_4 = arith.constant 0 : index
    %3 = vector.load %arg4[%c0_3, %c0_4] : memref<1x128xf32, #tpu.memory_space<vmem>>, vector<1x128xf32>
    %4 = vector.broadcast %3 : vector<1x128xf32> to vector<2048x128xf32>
    %5 = arith.addf %2, %4 : vector<2048x128xf32>
    %cst_5 = arith.constant 1.000000e-01 : f32
    %6 = vector.broadcast %cst_5 : f32 to vector<2048x128xf32>
    %7 = arith.mulf %6, %5 : vector<2048x128xf32>
    %8 = arith.maximumf %5, %7 : vector<2048x128xf32>
    %9 = arith.truncf %8 : vector<2048x128xf32> to vector<2048x128xbf16>
    %c0_6 = arith.constant 0 : index
    %c0_7 = arith.constant 0 : index
    %10 = vector.load %arg5[%c0_6, %c0_7] : memref<2048x128xbf16, #tpu.memory_space<vmem>>, vector<2048x128xbf16>
    tpu.vector_store %arg5[%c0_6, %c0_7], %9 {strides = array<i32>} : memref<2048x128xbf16, #tpu.memory_space<vmem>>, vector<2048x128xbf16>,
    return
  }
  func.func @transform_0(%arg0: i32, %arg1: i32) -> (i32, i32) {
    %c0_i32 = arith.constant 0 : i32
    %c0_i32_0 = arith.constant 0 : i32
    return %arg0, %c0_i32 : i32, i32
  }
  func.func @transform_1(%arg0: i32, %arg1: i32) -> (i32, i32) {
    %c0_i32 = arith.constant 0 : i32
    %c0_i32_0 = arith.constant 0 : i32
    return %c0_i32, %arg1 : i32, i32
  }
  func.func @transform_2(%arg0: i32, %arg1: i32) -> (i32, i32) {
    %c0_i32 = arith.constant 0 : i32
    %c0_i32_0 = arith.constant 0 : i32
    return %c0_i32, %arg1 : i32, i32
  }
  func.func @transform_3(%arg0: i32, %arg1: i32) -> (i32, i32) {
    %c0_i32 = arith.constant 0 : i32
    return %arg0, %arg1 : i32, i32
  }
}

</mosaic_0001>

<bundles_post_ra>
// kernel: fused_matmul.1
= control target key start
LH: loop header
LB: loop body
LE: loop exit
PB: predicated region body
PF: predicated region fallthrough
CT: control target
= control target key end

     0   :  { %8 = vsyncpa [#allocation3], 0  ;;  %s6402_s0 = inlined_call_operand.hbm [shape: bf16[2048,128], index: 0, kind: input, shape index: {}]   ;;  %s6403_s1 = inlined_call_operand.hbm [shape: bf16[128,128], index: 1, kind: input, shape index: {}]   ;;  %s6404_s2 = inlined_call_operand.vmem [shape: f32[1,128], index: 2, kind: input, shape index: {}]   ;;  %s6405_s3 = inlined_call_operand.hbm [shape: bf16[2048,128], index: 3, kind: output, shape index: {}]  }
   0x1   :  { %9 = vsyncpa [#allocation6], 0 }
   0x2   :  { %10 = vsyncpa [#allocation4], 0  ;;  %s6061_s12 = smov [#allocation2]   ;;  %s5989_s16 = scalar_lea.hbm %s6402_s0, 16384 }
   0x3   :  { %s16_s13 = sshll.u32 %s6061_s12, 4  ;;  %p5990_p0 = scmp.ne.s32.totalorder %s6402_s0, %s5989_s16  ;;  %s17_s13 = int_to_ptr.vmem [resolvable:$true] %s16_s13 }
   0x4   :  { %p5993_p1 = scmp.lt.u32.totalorder %s5989_s16, %s6402_s0 }
   0x6   :  { %p5995_p2 = pnand %p5993_p1, %p5990_p0 }
   0x8   :  { %5998 = shalt.err (!%p5995_p2)
}
   0x9   :  { %s5999_s21 = scalar_lea.vmem %s17_s13, 16384  ;;  %p6004_p4 = scmp.lt.s32.totalorder %s17_s13, %s17_s13 }
   0xa   :  { %p6000_p3 = scmp.ne.s32.totalorder %s17_s13, %s5999_s21  ;;  %p6005_p5 = scmp.lt.s32.totalorder %s5999_s21, %s5999_s21 }
   0xc   :  { %p6006_p6 = por %p6005_p5, %p6004_p4 }
   0xe   :  { %p6007_p7 = pnand %p6006_p6, %p6000_p3 }
  0x10   :  { %6010 = shalt.err (!%p6007_p7)
}
  0x11   :  { %s6062_s22 = smov 64   ;;  %s6063_s23 = smov 4  }
  0x12   :  { %22 = dma.hbm_to_vmem [thread:$0]  %s6402_s0, 16384, %s17_s13, [#allocation3], %s6062_s22, %s6062_s22, %s6063_s23  }
  0x13   :  { %s6064_s26 = smov [#allocation5]   ;;  %s6011_s30 = scalar_lea.hbm %s6403_s1, 1024 }
  0x14   :  { %s28_s27 = sshll.u32 %s6064_s26, 4  ;;  %p6012_p8 = scmp.ne.s32.totalorder %s6403_s1, %s6011_s30  ;;  %s29_s27 = int_to_ptr.vmem [resolvable:$true] %s28_s27 }
  0x15   :  { %p6015_p9 = scmp.lt.u32.totalorder %s6011_s30, %s6403_s1 }
  0x17   :  { %p6017_p10 = pnand %p6015_p9, %p6012_p8 }
  0x19   :  { %6020 = shalt.err (!%p6017_p10)
}
  0x1a   :  { %s6021_s8 = scalar_lea.vmem %s29_s27, 1024  ;;  %p6026_p12 = scmp.lt.s32.totalorder %s29_s27, %s29_s27 }
  0x1b   :  { %p6022_p11 = scmp.ne.s32.totalorder %s29_s27, %s6021_s8  ;;  %p6027_p13 = scmp.lt.s32.totalorder %s6021_s8, %s6021_s8 }
  0x1d   :  { %p6028_p0 = por %p6027_p13, %p6026_p12 }
  0x1f   :  { %p6029_p1 = pnand %p6028_p0, %p6022_p11 }
  0x21   :  { %6032 = shalt.err (!%p6029_p1)
}
  0x22   :  { %34 = dma.hbm_to_vmem [thread:$0]  %s6403_s1, 1024, %s29_s27, [#allocation6], %s6062_s22, %s6062_s22, %s6063_s23  }
  0x23   :  { %6055 = dma.done.wait [#allocation3], 16384  }
  0x24   :  { %6056 = vsyncadd [#allocation3], 4294950912 }
  0x25   :  { %6057 = dma.done.wait [#allocation6], 1024  }
  0x26   :  { %6058 = vsyncadd [#allocation6], 4294966272  ;;  %v5851_v0 = vld [vmem:[#allocation5] sm:$0xff]   ;;  %v5852_v1 = vld [vmem:[#allocation5 + $0x8] sm:$0xff]  }
  0x27   :  { %5558 = vmatprep.subr.bf16.mxu0 %v5851_v0  ;;  %5830 = vmatprep.subr.bf16.mxu1 %v5851_v0  ;;  %v5853_v2 = vld [vmem:[#allocation5 + $0x10] sm:$0xff]   ;;  %v5854_v3 = vld [vmem:[#allocation5 + $0x18] sm:$0xff]   ;;  %v5859_v4 = vld [vmem:[#allocation2] sm:$0xff]  }
  0x28   :  { %5559 = vmatpush3.bf16.msra.mxu0 %v5851_v0  ;;  %5838 = vmatpush3.bf16.msra.mxu1 %v5851_v0  ;;  %v5860_v5 = vld [vmem:[#allocation2 + $0x200] sm:$0xff]   ;;  %v5856_v7 = vld [vmem:[#allocation5 + $0x28] sm:$0xff]   ;;  %v5857_v8 = vld [vmem:[#allocation5 + $0x30] sm:$0xff]  }
  0x29   :  { %5560 = vmatprep.subr.bf16.mxu0 %v5852_v1  ;;  %5831 = vmatprep.subr.bf16.mxu1 %v5852_v1  ;;  %v5855_v6 = vld [vmem:[#allocation5 + $0x20] sm:$0xff]   ;;  %v5858_v9 = vld [vmem:[#allocation5 + $0x38] sm:$0xff]   ;;  %v5861_v10 = vld [vmem:[#allocation2 + $0x8] sm:$0xff]  }
  0x2a   :  { %5574 = vmatprep.mubr.bf16.mxu0 %v5859_v4  ;;  %5702 = vmatprep.mubr.bf16.mxu1 %v5860_v5  ;;  %v5862_v11 = vld [vmem:[#allocation2 + $0x208] sm:$0xff]   ;;  %v5863_v12 = vld [vmem:[#allocation2 + $0x10] sm:$0xff]   ;;  %v5865_v14 = vld [vmem:[#allocation2 + $0x18] sm:$0xff]  }
  0x2b   :  { %v5864_v13 = vld [vmem:[#allocation2 + $0x210] sm:$0xff]   ;;  %v5866_v15 = vld [vmem:[#allocation2 + $0x218] sm:$0xff]   ;;  %v5867_v16 = vld [vmem:[#allocation2 + $0x20] sm:$0xff]  }
  0x2c   :  { %5561 = vmatpush3.bf16.msra.mxu0 %v5852_v1  ;;  %5839 = vmatpush3.bf16.msra.mxu1 %v5852_v1  ;;  %v5868_v17 = vld [vmem:[#allocation2 + $0x220] sm:$0xff]   ;;  %v5869_v18 = vld [vmem:[#allocation2 + $0x28] sm:$0xff]   ;;  %v5871_v20 = vld [vmem:[#allocation2 + $0x30] sm:$0xff]  }
  0x2d   :  { %5562 = vmatprep.subr.bf16.mxu0 %v5853_v2  ;;  %5832 = vmatprep.subr.bf16.mxu1 %v5853_v2  ;;  %v5870_v19 = vld [vmem:[#allocation2 + $0x228] sm:$0xff]   ;;  %v5872_v21 = vld [vmem:[#allocation2 + $0x230] sm:$0xff]   ;;  %v5873_v22 = vld [vmem:[#allocation2 + $0x38] sm:$0xff]  }
  0x2e   :  { %v5874_v23 = vld [vmem:[#allocation2 + $0x238] sm:$0xff]   ;;  %v5875_v24 = vld [vmem:[#allocation2 + $0x40] sm:$0xff]   ;;  %v5877_v26 = vld [vmem:[#allocation2 + $0x48] sm:$0xff]  }
  0x2f   :  { %v5876_v25 = vld [vmem:[#allocation2 + $0x240] sm:$0xff]   ;;  %v5878_v27 = vld [vmem:[#allocation2 + $0x248] sm:$0xff]   ;;  %v5879_v28 = vld [vmem:[#allocation2 + $0x50] sm:$0xff]  }
  0x30   :  { %5563 = vmatpush3.bf16.msra.mxu0 %v5853_v2  ;;  %5840 = vmatpush3.bf16.msra.mxu1 %v5853_v2  ;;  %v5880_v29 = vld [vmem:[#allocation2 + $0x250] sm:$0xff]   ;;  %v5881_v30 = vld [vmem:[#allocation2 + $0x58] sm:$0xff]   ;;  %v5883_v32 = vld [vmem:[#allocation2 + $0x60] sm:$0xff]  }
  0x31   :  { %5564 = vmatprep.subr.bf16.mxu0 %v5854_v3  ;;  %5833 = vmatprep.subr.bf16.mxu1 %v5854_v3  ;;  %v5882_v31 = vld [vmem:[#allocation2 + $0x258] sm:$0xff]   ;;  %v5884_v33 = vld [vmem:[#allocation2 + $0x260] sm:$0xff]   ;;  %v5885_v34 = vld [vmem:[#allocation2 + $0x68] sm:$0xff]  }
  0x32   :  { %v5886_v35 = vld [vmem:[#allocation2 + $0x268] sm:$0xff]   ;;  %v5887_v36 = vld [vmem:[#allocation2 + $0x70] sm:$0xff]   ;;  %v5889_v38 = vld [vmem:[#allocation2 + $0x78] sm:$0xff]  }
  0x33   :  { %v5888_v37 = vld [vmem:[#allocation2 + $0x270] sm:$0xff]   ;;  %v5890_v39 = vld [vmem:[#allocation2 + $0x278] sm:$0xff]   ;;  %v5891_v40 = vld [vmem:[#allocation2 + $0x80] sm:$0xff]  }
  0x34   :  { %5565 = vmatpush3.bf16.msra.mxu0 %v5854_v3  ;;  %5841 = vmatpush3.bf16.msra.mxu1 %v5854_v3  ;;  %v5892_v41 = vld [vmem:[#allocation2 + $0x280] sm:$0xff]   ;;  %v5893_v42 = vld [vmem:[#allocation2 + $0x88] sm:$0xff]   ;;  %v5895_v44 = vld [vmem:[#allocation2 + $0x90] sm:$0xff]  }
  0x35   :  { %5566 = vmatprep.subr.bf16.mxu0 %v5855_v6  ;;  %5834 = vmatprep.subr.bf16.mxu1 %v5855_v6  ;;  %v5894_v43 = vld [vmem:[#allocation2 + $0x288] sm:$0xff]   ;;  %v5896_v45 = vld [vmem:[#allocation2 + $0x290] sm:$0xff]   ;;  %v5897_v46 = vld [vmem:[#allocation2 + $0x98] sm:$0xff]  }
  0x36   :  { %v5898_v47 = vld [vmem:[#allocation2 + $0x298] sm:$0xff]   ;;  %v5899_v48 = vld [vmem:[#allocation2 + $0xa0] sm:$0xff]   ;;  %v5901_v50 = vld [vmem:[#allocation2 + $0xa8] sm:$0xff]  }
  0x37   :  { %v5900_v49 = vld [vmem:[#allocation2 + $0x2a0] sm:$0xff]   ;;  %v5902_v51 = vld [vmem:[#allocation2 + $0x2a8] sm:$0xff]   ;;  %v5903_v52 = vld [vmem:[#allocation2 + $0xb0] sm:$0xff]  }
  0x38   :  { %5567 = vmatpush3.bf16.msra.mxu0 %v5855_v6  ;;  %5842 = vmatpush3.bf16.msra.mxu1 %v5855_v6  ;;  %v5904_v53 = vld [vmem:[#allocation2 + $0x2b0] sm:$0xff]   ;;  %v5905_v54 = vld [vmem:[#allocation2 + $0xb8] sm:$0xff]   ;;  %v5907_v56 = vld [vmem:[#allocation2 + $0xc0] sm:$0xff]  }
  0x39   :  { %5568 = vmatprep.subr.bf16.mxu0 %v5856_v7  ;;  %5835 = vmatprep.subr.bf16.mxu1 %v5856_v7  ;;  %v5906_v55 = vld [vmem:[#allocation2 + $0x2b8] sm:$0xff]   ;;  %v5908_v57 = vld [vmem:[#allocation2 + $0x2c0] sm:$0xff]   ;;  %v5909_v58 = vld [vmem:[#allocation2 + $0xc8] sm:$0xff]  }
  0x3a   :  { %v5910_v59 = vld [vmem:[#allocation2 + $0x2c8] sm:$0xff]   ;;  %v5911_v60 = vld [vmem:[#allocation2 + $0xd0] sm:$0xff]   ;;  %v5913_v62 = vld [vmem:[#allocation2 + $0xd8] sm:$0xff]  }
  0x3b   :  { %v5912_v61 = vld [vmem:[#allocation2 + $0x2d0] sm:$0xff]   ;;  %v5914_v63 = vld [vmem:[#allocation2 + $0x2d8] sm:$0xff]   ;;  %v5915_v0 = vld [vmem:[#allocation2 + $0xe0] sm:$0xff]  }
  0x3c   :  { %5569 = vmatpush3.bf16.msra.mxu0 %v5856_v7  ;;  %5843 = vmatpush3.bf16.msra.mxu1 %v5856_v7  ;;  %v5916_v1 = vld [vmem:[#allocation2 + $0x2e0] sm:$0xff]   ;;  %v5917_v2 = vld [vmem:[#allocation2 + $0xe8] sm:$0xff]   ;;  %v5919_v4 = vld [vmem:[#allocation2 + $0xf0] sm:$0xff]  }
  0x3d   :  { %5570 = vmatprep.subr.bf16.mxu0 %v5857_v8  ;;  %5836 = vmatprep.subr.bf16.mxu1 %v5857_v8  ;;  %v5918_v3 = vld [vmem:[#allocation2 + $0x2e8] sm:$0xff]   ;;  %v5920_v5 = vld [vmem:[#allocation2 + $0x2f0] sm:$0xff]   ;;  %v5921_v6 = vld [vmem:[#allocation2 + $0xf8] sm:$0xff]  }
  0x3e   :  { %v5922_v7 = vld [vmem:[#allocation2 + $0x2f8] sm:$0xff]  }
  0x40   :  { %5571 = vmatpush3.bf16.msra.mxu0 %v5857_v8  ;;  %5844 = vmatpush3.bf16.msra.mxu1 %v5857_v8  ;;  %v5923_v8 = vld [vmem:[#allocation2 + $0x100] sm:$0xff]  }
  0x41   :  { %5572 = vmatprep.subr.bf16.mxu0 %v5858_v9  ;;  %5837 = vmatprep.subr.bf16.mxu1 %v5858_v9 }
  0x44   :  { %5573 = vmatpush3.bf16.msra.mxu0 %v5858_v9  ;;  %5845 = vmatpush3.bf16.msra.mxu1 %v5858_v9  ;;  %v5924_v9 = vld [vmem:[#allocation2 + $0x300] sm:$0xff]  }
  0x47   :  { %5575 = vmatmul.mubr.bf16.vlgmr.msra.gmra.mrb[0].mxu0 %v5861_v10  ;;  %5703 = vmatmul.mubr.bf16.vlgmr.msra.gmra.mrb[0].mxu1 %v5862_v11  ;;  %v5925_v10 = vld [vmem:[#allocation2 + $0x108] sm:$0xff]  }
  0x48   :  { %5578 = vmatprep.mubr.bf16.mxu0 %v5863_v12  ;;  %5706 = vmatprep.mubr.bf16.mxu1 %v5864_v13  ;;  %v5926_v11 = vld [vmem:[#allocation2 + $0x308] sm:$0xff]   ;;  %v5927_v12 = vld [vmem:[#allocation2 + $0x110] sm:$0xff]  }
  0x49   :  { %v5928_v13 = vld [vmem:[#allocation2 + $0x310] sm:$0xff]  }
  0x4f   :  { %5579 = vmatmul.mubr.bf16.gmra.mrb[4].mxu0 %v5865_v14  ;;  %5707 = vmatmul.mubr.bf16.gmra.mrb[4].mxu1 %v5866_v15  ;;  %v5929_v14 = vld [vmem:[#allocation2 + $0x118] sm:$0xff]  }
  0x50   :  { %5582 = vmatprep.mubr.bf16.mxu0 %v5867_v16  ;;  %5710 = vmatprep.mubr.bf16.mxu1 %v5868_v17  ;;  %v5930_v15 = vld [vmem:[#allocation2 + $0x318] sm:$0xff]   ;;  %v5931_v16 = vld [vmem:[#allocation2 + $0x120] sm:$0xff]  }
  0x51   :  { %v5932_v17 = vld [vmem:[#allocation2 + $0x320] sm:$0xff]  }
  0x57   :  { %5583 = vmatmul.mubr.bf16.gmra.mrb[8].mxu0 %v5869_v18  ;;  %5711 = vmatmul.mubr.bf16.gmra.mrb[8].mxu1 %v5870_v19  ;;  %v5933_v18 = vld [vmem:[#allocation2 + $0x128] sm:$0xff]  }
  0x58   :  { %5586 = vmatprep.mubr.bf16.mxu0 %v5871_v20  ;;  %5714 = vmatprep.mubr.bf16.mxu1 %v5872_v21  ;;  %v5934_v19 = vld [vmem:[#allocation2 + $0x328] sm:$0xff]   ;;  %v5935_v20 = vld [vmem:[#allocation2 + $0x130] sm:$0xff]  }
  0x59   :  { %v5936_v21 = vld [vmem:[#allocation2 + $0x330] sm:$0xff]  }
  0x5f   :  { %5587 = vmatmul.mubr.bf16.gmra.mrb[12].mxu0 %v5873_v22  ;;  %5715 = vmatmul.mubr.bf16.gmra.mrb[12].mxu1 %v5874_v23  ;;  %v5937_v22 = vld [vmem:[#allocation2 + $0x138] sm:$0xff]  }
  0x60   :  { %5590 = vmatprep.mubr.bf16.mxu0 %v5875_v24  ;;  %5718 = vmatprep.mubr.bf16.mxu1 %v5876_v25  ;;  %v5938_v23 = vld [vmem:[#allocation2 + $0x338] sm:$0xff]   ;;  %v5939_v24 = vld [vmem:[#allocation2 + $0x140] sm:$0xff]  }
  0x61   :  { %v5940_v25 = vld [vmem:[#allocation2 + $0x340] sm:$0xff]  }
  0x67   :  { %5591 = vmatmul.mubr.bf16.gmra.mrb[16].mxu0 %v5877_v26  ;;  %5719 = vmatmul.mubr.bf16.gmra.mrb[16].mxu1 %v5878_v27  ;;  %v5941_v26 = vld [vmem:[#allocation2 + $0x148] sm:$0xff]  }
  0x68   :  { %5594 = vmatprep.mubr.bf16.mxu0 %v5879_v28  ;;  %5722 = vmatprep.mubr.bf16.mxu1 %v5880_v29  ;;  %v5942_v27 = vld [vmem:[#allocation2 + $0x348] sm:$0xff]   ;;  %v5943_v28 = vld [vmem:[#allocation2 + $0x150] sm:$0xff]  }
  0x69   :  { %v5944_v29 = vld [vmem:[#allocation2 + $0x350] sm:$0xff]  }
  0x6f   :  { %5595 = vmatmul.mubr.bf16.gmra.mrb[20].mxu0 %v5881_v30  ;;  %5723 = vmatmul.mubr.bf16.gmra.mrb[20].mxu1 %v5882_v31  ;;  %v5945_v30 = vld [vmem:[#allocation2 + $0x158] sm:$0xff]  }
  0x70   :  { %5598 = vmatprep.mubr.bf16.mxu0 %v5883_v32  ;;  %5726 = vmatprep.mubr.bf16.mxu1 %v5884_v33  ;;  %v5946_v31 = vld [vmem:[#allocation2 + $0x358] sm:$0xff]   ;;  %v5947_v32 = vld [vmem:[#allocation2 + $0x160] sm:$0xff]  }
  0x71   :  { %v5948_v33 = vld [vmem:[#allocation2 + $0x360] sm:$0xff]  }
  0x77   :  { %5599 = vmatmul.mubr.bf16.gmra.mrb[24].mxu0 %v5885_v34  ;;  %5727 = vmatmul.mubr.bf16.gmra.mrb[24].mxu1 %v5886_v35  ;;  %v5949_v34 = vld [vmem:[#allocation2 + $0x168] sm:$0xff]  }
  0x78   :  { %5602 = vmatprep.mubr.bf16.mxu0 %v5887_v36  ;;  %5730 = vmatprep.mubr.bf16.mxu1 %v5888_v37  ;;  %v5950_v35 = vld [vmem:[#allocation2 + $0x368] sm:$0xff]   ;;  %v5951_v36 = vld [vmem:[#allocation2 + $0x170] sm:$0xff]  }
  0x79   :  { %v5952_v37 = vld [vmem:[#allocation2 + $0x370] sm:$0xff]  }
  0x7f   :  { %5603 = vmatmul.mubr.bf16.gmra.mrb[28].mxu0 %v5889_v38  ;;  %5731 = vmatmul.mubr.bf16.gmra.mrb[28].mxu1 %v5890_v39  ;;  %v5953_v38 = vld [vmem:[#allocation2 + $0x178] sm:$0xff]  }
  0x80   :  { %5606 = vmatprep.mubr.bf16.mxu0 %v5891_v40  ;;  %5734 = vmatprep.mubr.bf16.mxu1 %v5892_v41  ;;  %v5954_v39 = vld [vmem:[#allocation2 + $0x378] sm:$0xff]   ;;  %v5955_v40 = vld [vmem:[#allocation2 + $0x180] sm:$0xff]  }
  0x81   :  { %v5956_v41 = vld [vmem:[#allocation2 + $0x380] sm:$0xff]  }
  0x87   :  { %5607 = vmatmul.mubr.bf16.gmra.mrb[32].mxu0 %v5893_v42  ;;  %5735 = vmatmul.mubr.bf16.gmra.mrb[32].mxu1 %v5894_v43  ;;  %v5957_v42 = vld [vmem:[#allocation2 + $0x188] sm:$0xff]  }
  0x88   :  { %5610 = vmatprep.mubr.bf16.mxu0 %v5895_v44  ;;  %5738 = vmatprep.mubr.bf16.mxu1 %v5896_v45  ;;  %v5958_v43 = vld [vmem:[#allocation2 + $0x388] sm:$0xff]   ;;  %v5959_v44 = vld [vmem:[#allocation2 + $0x190] sm:$0xff]  }
  0x89   :  { %v5960_v45 = vld [vmem:[#allocation2 + $0x390] sm:$0xff]  }
  0x8f   :  { %5611 = vmatmul.mubr.bf16.gmra.mrb[36].mxu0 %v5897_v46  ;;  %5739 = vmatmul.mubr.bf16.gmra.mrb[36].mxu1 %v5898_v47  ;;  %v5961_v46 = vld [vmem:[#allocation2 + $0x198] sm:$0xff]  }
  0x90   :  { %5614 = vmatprep.mubr.bf16.mxu0 %v5899_v48  ;;  %5742 = vmatprep.mubr.bf16.mxu1 %v5900_v49  ;;  %v5962_v47 = vld [vmem:[#allocation2 + $0x398] sm:$0xff]   ;;  %v5963_v48 = vld [vmem:[#allocation2 + $0x1a0] sm:$0xff]  }
  0x91   :  { %v5964_v49 = vld [vmem:[#allocation2 + $0x3a0] sm:$0xff]  }
  0x97   :  { %5615 = vmatmul.mubr.bf16.gmra.mrb[40].mxu0 %v5901_v50  ;;  %5743 = vmatmul.mubr.bf16.gmra.mrb[40].mxu1 %v5902_v51  ;;  %v5965_v50 = vld [vmem:[#allocation2 + $0x1a8] sm:$0xff]  }
  0x98   :  { %5618 = vmatprep.mubr.bf16.mxu0 %v5903_v52  ;;  %5746 = vmatprep.mubr.bf16.mxu1 %v5904_v53  ;;  %v5966_v51 = vld [vmem:[#allocation2 + $0x3a8] sm:$0xff]   ;;  %v5967_v52 = vld [vmem:[#allocation2 + $0x1b0] sm:$0xff]  }
  0x99   :  { %v5968_v53 = vld [vmem:[#allocation2 + $0x3b0] sm:$0xff]  }
  0x9f   :  { %5619 = vmatmul.mubr.bf16.gmra.mrb[44].mxu0 %v5905_v54  ;;  %5747 = vmatmul.mubr.bf16.gmra.mrb[44].mxu1 %v5906_v55  ;;  %v6119_v54 = vld [vmem:[%s6404_s2] ss:$0 sm:$0xff] }
  0xa0   :  { %5622 = vmatprep.mubr.bf16.mxu0 %v5907_v56  ;;  %5750 = vmatprep.mubr.bf16.mxu1 %v5908_v57 }
  0xa7   :  { %5623 = vmatmul.mubr.bf16.gmra.mrb[48].mxu0 %v5909_v58  ;;  %5751 = vmatmul.mubr.bf16.gmra.mrb[48].mxu1 %v5910_v59 }
  0xa8   :  { %5626 = vmatprep.mubr.bf16.mxu0 %v5911_v60  ;;  %5754 = vmatprep.mubr.bf16.mxu1 %v5912_v61  ;;  %v5969_v61 = vld [vmem:[#allocation2 + $0x1b8] sm:$0xff]  }
  0xaf   :  { %5627 = vmatmul.mubr.bf16.gmra.mrb[52].mxu0 %v5913_v62  ;;  %5755 = vmatmul.mubr.bf16.gmra.mrb[52].mxu1 %v5914_v63  ;;  %v5970_v62 = vld [vmem:[#allocation2 + $0x3b8] sm:$0xff]  }
  0xb0   :  { %5630 = vmatprep.mubr.bf16.mxu0 %v5915_v0  ;;  %5758 = vmatprep.mubr.bf16.mxu1 %v5916_v1 }
  0xb7   :  { %5631 = vmatmul.mubr.bf16.gmra.mrb[56].mxu0 %v5917_v2  ;;  %5759 = vmatmul.mubr.bf16.gmra.mrb[56].mxu1 %v5918_v3  ;;  %v5971_v3 = vld [vmem:[#allocation2 + $0x1c0] sm:$0xff]  }
  0xb8   :  { %5634 = vmatprep.mubr.bf16.mxu0 %v5919_v4  ;;  %5762 = vmatprep.mubr.bf16.mxu1 %v5920_v5  ;;  %v5972_v4 = vld [vmem:[#allocation2 + $0x3c0] sm:$0xff]  }
  0xbf   :  { %5635 = vmatmul.mubr.bf16.gmra.mrb[60].mxu0 %v5921_v6  ;;  %5763 = vmatmul.mubr.bf16.gmra.mrb[60].mxu1 %v5922_v7 }
  0xc0   :  { %5638 = vmatprep.mubr.bf16.mxu0 %v5923_v8  ;;  %5766 = vmatprep.mubr.bf16.mxu1 %v5924_v9 }
  0xc7   :  { %5639 = vmatmul.mubr.bf16.gmra.mrb[64].mxu0 %v5925_v10  ;;  %5767 = vmatmul.mubr.bf16.gmra.mrb[64].mxu1 %v5926_v11 }
  0xc8   :  { %5642 = vmatprep.mubr.bf16.mxu0 %v5927_v12  ;;  %5770 = vmatprep.mubr.bf16.mxu1 %v5928_v13 }
  0xcf   :  { %5643 = vmatmul.mubr.bf16.gmra.mrb[68].mxu0 %v5929_v14  ;;  %5771 = vmatmul.mubr.bf16.gmra.mrb[68].mxu1 %v5930_v15 }
  0xd0   :  { %5646 = vmatprep.mubr.bf16.mxu0 %v5931_v16  ;;  %5774 = vmatprep.mubr.bf16.mxu1 %v5932_v17 }
  0xd7   :  { %5647 = vmatmul.mubr.bf16.gmra.mrb[72].mxu0 %v5933_v18  ;;  %5775 = vmatmul.mubr.bf16.gmra.mrb[72].mxu1 %v5934_v19 }
  0xd8   :  { %5650 = vmatprep.mubr.bf16.mxu0 %v5935_v20  ;;  %5778 = vmatprep.mubr.bf16.mxu1 %v5936_v21 }
  0xdf   :  { %5651 = vmatmul.mubr.bf16.gmra.mrb[76].mxu0 %v5937_v22  ;;  %5779 = vmatmul.mubr.bf16.gmra.mrb[76].mxu1 %v5938_v23 }
  0xe0   :  { %5654 = vmatprep.mubr.bf16.mxu0 %v5939_v24  ;;  %5782 = vmatprep.mubr.bf16.mxu1 %v5940_v25 }
  0xe7   :  { %5655 = vmatmul.mubr.bf16.gmra.mrb[80].mxu0 %v5941_v26  ;;  %5783 = vmatmul.mubr.bf16.gmra.mrb[80].mxu1 %v5942_v27 }
  0xe8   :  { %5658 = vmatprep.mubr.bf16.mxu0 %v5943_v28  ;;  %5786 = vmatprep.mubr.bf16.mxu1 %v5944_v29 }
  0xef   :  { %5659 = vmatmul.mubr.bf16.gmra.mrb[84].mxu0 %v5945_v30  ;;  %5787 = vmatmul.mubr.bf16.gmra.mrb[84].mxu1 %v5946_v31 }
  0xf0   :  { %5662 = vmatprep.mubr.bf16.mxu0 %v5947_v32  ;;  %5790 = vmatprep.mubr.bf16.mxu1 %v5948_v33 }
  0xf7   :  { %5663 = vmatmul.mubr.bf16.gmra.mrb[88].mxu0 %v5949_v34  ;;  %5791 = vmatmul.mubr.bf16.gmra.mrb[88].mxu1 %v5950_v35  ;;  %v5973_v35 = vld [vmem:[#allocation2 + $0x1c8] sm:$0xff]  }
  0xf8   :  { %5666 = vmatprep.mubr.bf16.mxu0 %v5951_v36  ;;  %5794 = vmatprep.mubr.bf16.mxu1 %v5952_v37  ;;  %v5974_v36 = vld [vmem:[#allocation2 + $0x3c8] sm:$0xff]  }
  0xff   :  { %5667 = vmatmul.mubr.bf16.gmra.mrb[92].mxu0 %v5953_v38  ;;  %5795 = vmatmul.mubr.bf16.gmra.mrb[92].mxu1 %v5954_v39 }
 0x100   :  { %5670 = vmatprep.mubr.bf16.mxu0 %v5955_v40  ;;  %5798 = vmatprep.mubr.bf16.mxu1 %v5956_v41 }
 0x107   :  { %5671 = vmatmul.mubr.bf16.gmra.mrb[96].mxu0 %v5957_v42  ;;  %5799 = vmatmul.mubr.bf16.gmra.mrb[96].mxu1 %v5958_v43  ;;  %v5975_v43 = vld [vmem:[#allocation2 + $0x1d0] sm:$0xff]  }
 0x108   :  { %5674 = vmatprep.mubr.bf16.mxu0 %v5959_v44  ;;  %5802 = vmatprep.mubr.bf16.mxu1 %v5960_v45  ;;  %v5976_v44 = vld [vmem:[#allocation2 + $0x3d0] sm:$0xff]  }
 0x10f   :  { %5675 = vmatmul.mubr.bf16.gmra.mrb[100].mxu0 %v5961_v46  ;;  %5803 = vmatmul.mubr.bf16.gmra.mrb[100].mxu1 %v5962_v47 }
 0x110   :  { %5678 = vmatprep.mubr.bf16.mxu0 %v5963_v48  ;;  %5806 = vmatprep.mubr.bf16.mxu1 %v5964_v49 }
 0x117   :  { %5679 = vmatmul.mubr.bf16.gmra.mrb[104].mxu0 %v5965_v50  ;;  %5807 = vmatmul.mubr.bf16.gmra.mrb[104].mxu1 %v5966_v51 }
 0x118   :  { %5682 = vmatprep.mubr.bf16.mxu0 %v5967_v52  ;;  %5810 = vmatprep.mubr.bf16.mxu1 %v5968_v53 }
 0x11a   :  { %v5576_v55 = vpop.f32.mrb[0].mxu0  ;;  %v5704_v56 = vpop.f32.mrb[0].mxu1 }
 0x11b   :  { %v1182_v57 = vadd.f32 %v5576_v55, %v6119_v54  ;;  %v1694_v58 = vadd.f32 %v5704_v56, %v6119_v54  ;;  %v1173_v59 = vpop.f32.mrb[1].mxu0  ;;  %v1685_v60 = vpop.f32.mrb[1].mxu1 }
 0x11c   :  { %v1174_v63 = vadd.f32 %v6119_v54, %v1173_v59  ;;  %v1686_v0 = vadd.f32 %v6119_v54, %v1685_v60  ;;  %v5577_v1 = vpop.f32.mrb[2].mxu0  ;;  %v5705_v2 = vpop.f32.mrb[2].mxu1 }
 0x11d   :  { %v2198_v5 = vmul.f32 0.1, %v1182_v57  ;;  %v2326_v6 = vmul.f32 0.1, %v1694_v58  ;;  %v1185_v7 = vadd.f32 %v5577_v1, %v6119_v54  ;;  %v1697_v8 = vadd.f32 %v5705_v2, %v6119_v54  ;;  %v1176_v9 = vpop.f32.mrb[3].mxu0  ;;  %v1688_v10 = vpop.f32.mrb[3].mxu1 }
 0x11e   :  { %v2196_v11 = vmul.f32 0.1, %v1174_v63  ;;  %v2324_v12 = vmul.f32 0.1, %v1686_v0  ;;  %v1177_v13 = vadd.f32 %v6119_v54, %v1176_v9  ;;  %v1689_v14 = vadd.f32 %v6119_v54, %v1688_v10 }
 0x11f   :  { %v2199_v15 = vmul.f32 0.1, %v1185_v7  ;;  %v2327_v16 = vmul.f32 0.1, %v1697_v8  ;;  %5683 = vmatmul.mubr.bf16.gmra.mrb[108].mxu0 %v5969_v61  ;;  %5811 = vmatmul.mubr.bf16.gmra.mrb[108].mxu1 %v5970_v62  ;;  %v2454_v19 = vmax.f32 %v1182_v57, %v2198_v5  ;;  %v2582_v20 = vmax.f32 %v1694_v58, %v2326_v6 }
 0x120   :  { %v2197_v17 = vmul.f32 0.1, %v1177_v13  ;;  %v2325_v18 = vmul.f32 0.1, %v1689_v14  ;;  %5686 = vmatprep.mubr.bf16.mxu0 %v5971_v3  ;;  %5814 = vmatprep.mubr.bf16.mxu1 %v5972_v4  ;;  %v2452_v23 = vmax.f32 %v1174_v63, %v2196_v11  ;;  %v2580_v24 = vmax.f32 %v1686_v0, %v2324_v12  ;;  %v5977_v12 = vld [vmem:[#allocation2 + $0x1d8] sm:$0xff]  }
 0x121   :  { %v2455_v21 = vmax.f32 %v1185_v7, %v2199_v15  ;;  %v2583_v22 = vmax.f32 %v1697_v8, %v2327_v16 }
 0x122   :  { %v2453_v25 = vmax.f32 %v1177_v13, %v2197_v17  ;;  %v2581_v26 = vmax.f32 %v1689_v14, %v2325_v18  ;;  %v5580_v27 = vpop.f32.mrb[4].mxu0  ;;  %v5708_v28 = vpop.f32.mrb[4].mxu1  ;;  %v5978_v13 = vld [vmem:[#allocation2 + $0x3d8] sm:$0xff]  }
 0x123   :  { %v4663_v29 = vpack.c.bf16 %v2455_v21, %v2454_v19  ;;  %v4983_v30 = vpack.c.bf16 %v2583_v22, %v2582_v20  ;;  %v1198_v31 = vadd.f32 %v5580_v27, %v6119_v54  ;;  %v1710_v32 = vadd.f32 %v5708_v28, %v6119_v54  ;;  %v1189_v33 = vpop.f32.mrb[5].mxu0  ;;  %v1701_v34 = vpop.f32.mrb[5].mxu1  ;;  %v5979_v20 = vld [vmem:[#allocation2 + $0x1e0] sm:$0xff]  }
 0x124   :  { %v4658_v37 = vpack.c.bf16 %v2453_v25, %v2452_v23  ;;  %v4978_v38 = vpack.c.bf16 %v2581_v26, %v2580_v24  ;;  %v1190_v39 = vadd.f32 %v6119_v54, %v1189_v33  ;;  %v1702_v40 = vadd.f32 %v6119_v54, %v1701_v34  ;;  %v5581_v41 = vpop.f32.mrb[6].mxu0  ;;  %v5709_v42 = vpop.f32.mrb[6].mxu1  ;;  %v5980_v21 = vld [vmem:[#allocation2 + $0x3e0] sm:$0xff]  }
 0x125   :  { %5295 = vst [vmem:[#allocation7 + $0x8] sm:$0xff] %v4663_v29   ;;  %5359 = vst [vmem:[#allocation7 + $0x208] sm:$0xff] %v4983_v30   ;;  %v2202_v45 = vmul.f32 0.1, %v1198_v31  ;;  %v2330_v46 = vmul.f32 0.1, %v1710_v32  ;;  %v1201_v47 = vadd.f32 %v5581_v41, %v6119_v54  ;;  %v1713_v48 = vadd.f32 %v5709_v42, %v6119_v54 }
 0x126   :  { %v1192_v49 = vpop.f32.mrb[7].mxu0  ;;  %v1704_v50 = vpop.f32.mrb[7].mxu1  ;;  %4659 = vst [vmem:[#allocation7] sm:$0xff] %v4658_v37   ;;  %5358 = vst [vmem:[#allocation7 + $0x200] sm:$0xff] %v4978_v38   ;;  %v2200_v51 = vmul.f32 0.1, %v1190_v39 }
 0x127   :  { %v2328_v52 = vmul.f32 0.1, %v1702_v40  ;;  %v1193_v53 = vadd.f32 %v6119_v54, %v1192_v49  ;;  %v1705_v55 = vadd.f32 %v6119_v54, %v1704_v50  ;;  %v2203_v56 = vmul.f32 0.1, %v1201_v47  ;;  %5687 = vmatmul.mubr.bf16.gmra.mrb[112].mxu0 %v5973_v35  ;;  %5815 = vmatmul.mubr.bf16.gmra.mrb[112].mxu1 %v5974_v36 }
 0x128   :  { %v2331_v57 = vmul.f32 0.1, %v1713_v48  ;;  %5690 = vmatprep.mubr.bf16.mxu0 %v5975_v43  ;;  %5818 = vmatprep.mubr.bf16.mxu1 %v5976_v44  ;;  %v2458_v60 = vmax.f32 %v1198_v31, %v2202_v45  ;;  %v2586_v61 = vmax.f32 %v1710_v32, %v2330_v46  ;;  %v2456_v0 = vmax.f32 %v1190_v39, %v2200_v51 }
 0x129   :  { %v2201_v58 = vmul.f32 0.1, %v1193_v53  ;;  %v2329_v59 = vmul.f32 0.1, %v1705_v55  ;;  %v2459_v62 = vmax.f32 %v1201_v47, %v2203_v56  ;;  %v2584_v1 = vmax.f32 %v1702_v40, %v2328_v52  ;;  %v5981_v52 = vld [vmem:[#allocation2 + $0x1e8] sm:$0xff]  }
 0x12a   :  { %v2587_v63 = vmax.f32 %v1713_v48, %v2331_v57  ;;  %v5584_v4 = vpop.f32.mrb[8].mxu0  ;;  %v5712_v5 = vpop.f32.mrb[8].mxu1 }
 0x12b   :  { %v2457_v2 = vmax.f32 %v1193_v53, %v2201_v58  ;;  %v2585_v3 = vmax.f32 %v1705_v55, %v2329_v59  ;;  %v4673_v6 = vpack.c.bf16 %v2459_v62, %v2458_v60  ;;  %v1214_v8 = vadd.f32 %v5584_v4, %v6119_v54  ;;  %v1205_v10 = vpop.f32.mrb[9].mxu0  ;;  %v1717_v11 = vpop.f32.mrb[9].mxu1  ;;  %v5982_v53 = vld [vmem:[#allocation2 + $0x3e8] sm:$0xff]   ;;  %v5984_v62 = vld [vmem:[#allocation2 + $0x3f0] sm:$0xff]  }
 0x12c   :  { %v4993_v7 = vpack.c.bf16 %v2587_v63, %v2586_v61  ;;  %v1726_v9 = vadd.f32 %v5712_v5, %v6119_v54  ;;  %v1206_v16 = vadd.f32 %v6119_v54, %v1205_v10  ;;  %v1718_v17 = vadd.f32 %v6119_v54, %v1717_v11  ;;  %v5585_v18 = vpop.f32.mrb[10].mxu0  ;;  %v5713_v19 = vpop.f32.mrb[10].mxu1  ;;  %v5983_v61 = vld [vmem:[#allocation2 + $0x1f0] sm:$0xff]  }
 0x12d   :  { %v4668_v14 = vpack.c.bf16 %v2457_v2, %v2456_v0  ;;  %v4988_v15 = vpack.c.bf16 %v2585_v3, %v2584_v1  ;;  %5297 = vst [vmem:[#allocation7 + $0x18] sm:$0xff] %v4673_v6   ;;  %v2206_v22 = vmul.f32 0.1, %v1214_v8  ;;  %v1217_v24 = vadd.f32 %v5585_v18, %v6119_v54  ;;  %v1208_v26 = vpop.f32.mrb[11].mxu0  ;;  %v1720_v27 = vpop.f32.mrb[11].mxu1 }
 0x12e   :  { %5361 = vst [vmem:[#allocation7 + $0x218] sm:$0xff] %v4993_v7   ;;  %v2334_v23 = vmul.f32 0.1, %v1726_v9  ;;  %v1729_v25 = vadd.f32 %v5713_v19, %v6119_v54  ;;  %v2204_v28 = vmul.f32 0.1, %v1206_v16  ;;  %v1209_v30 = vadd.f32 %v6119_v54, %v1208_v26 }
 0x12f   :  { %5296 = vst [vmem:[#allocation7 + $0x10] sm:$0xff] %v4668_v14   ;;  %5360 = vst [vmem:[#allocation7 + $0x210] sm:$0xff] %v4988_v15   ;;  %v2332_v29 = vmul.f32 0.1, %v1718_v17  ;;  %v1721_v31 = vadd.f32 %v6119_v54, %v1720_v27  ;;  %v2207_v32 = vmul.f32 0.1, %v1217_v24  ;;  %5691 = vmatmul.mubr.bf16.gmra.mrb[116].mxu0 %v5977_v12  ;;  %5819 = vmatmul.mubr.bf16.gmra.mrb[116].mxu1 %v5978_v13 }
 0x130   :  { %v2335_v33 = vmul.f32 0.1, %v1729_v25  ;;  %v2205_v34 = vmul.f32 0.1, %v1209_v30  ;;  %5694 = vmatprep.mubr.bf16.mxu0 %v5979_v20  ;;  %5822 = vmatprep.mubr.bf16.mxu1 %v5980_v21  ;;  %v2462_v36 = vmax.f32 %v1214_v8, %v2206_v22  ;;  %v2590_v37 = vmax.f32 %v1726_v9, %v2334_v23 }
 0x131   :  { %v2333_v35 = vmul.f32 0.1, %v1721_v31  ;;  %v2463_v38 = vmax.f32 %v1217_v24, %v2207_v32  ;;  %v2460_v40 = vmax.f32 %v1206_v16, %v2204_v28  ;;  %v2588_v41 = vmax.f32 %v1718_v17, %v2332_v29  ;;  %v5985_v29 = vld [vmem:[#allocation2 + $0x1f8] sm:$0xff]  }
 0x132   :  { %v2591_v39 = vmax.f32 %v1729_v25, %v2335_v33  ;;  %v2461_v42 = vmax.f32 %v1209_v30, %v2205_v34  ;;  %v5588_v44 = vpop.f32.mrb[12].mxu0  ;;  %v5716_v45 = vpop.f32.mrb[12].mxu1  ;;  %v5986_v30 = vld [vmem:[#allocation2 + $0x3f8] sm:$0xff]  }
 0x133   :  { %v2589_v43 = vmax.f32 %v1721_v31, %v2333_v35  ;;  %v4683_v46 = vpack.c.bf16 %v2463_v38, %v2462_v36  ;;  %v1230_v48 = vadd.f32 %v5588_v44, %v6119_v54  ;;  %v1742_v49 = vadd.f32 %v5716_v45, %v6119_v54  ;;  %v1221_v50 = vpop.f32.mrb[13].mxu0  ;;  %v1733_v51 = vpop.f32.mrb[13].mxu1 }
 0x134   :  { %v5003_v47 = vpack.c.bf16 %v2591_v39, %v2590_v37  ;;  %v4678_v55 = vpack.c.bf16 %v2461_v42, %v2460_v40  ;;  %v1222_v57 = vadd.f32 %v6119_v54, %v1221_v50  ;;  %v1734_v58 = vadd.f32 %v6119_v54, %v1733_v51  ;;  %v5589_v59 = vpop.f32.mrb[14].mxu0  ;;  %v5717_v60 = vpop.f32.mrb[14].mxu1 }
 0x135   :  { %v4998_v56 = vpack.c.bf16 %v2589_v43, %v2588_v41  ;;  %5299 = vst [vmem:[#allocation7 + $0x28] sm:$0xff] %v4683_v46   ;;  %v2210_v63 = vmul.f32 0.1, %v1230_v48  ;;  %v2338_v0 = vmul.f32 0.1, %v1742_v49  ;;  %v1233_v1 = vadd.f32 %v5589_v59, %v6119_v54  ;;  %v1224_v3 = vpop.f32.mrb[15].mxu0 }
 0x136   :  { %5363 = vst [vmem:[#allocation7 + $0x228] sm:$0xff] %v5003_v47   ;;  %v1745_v2 = vadd.f32 %v5717_v60, %v6119_v54  ;;  %v1736_v4 = vpop.f32.mrb[15].mxu1  ;;  %5298 = vst [vmem:[#allocation7 + $0x20] sm:$0xff] %v4678_v55   ;;  %v2208_v5 = vmul.f32 0.1, %v1222_v57  ;;  %v1225_v7 = vadd.f32 %v6119_v54, %v1224_v3 }
 0x137   :  { %5362 = vst [vmem:[#allocation7 + $0x220] sm:$0xff] %v4998_v56   ;;  %v2336_v6 = vmul.f32 0.1, %v1734_v58  ;;  %v1737_v8 = vadd.f32 %v6119_v54, %v1736_v4  ;;  %v2211_v9 = vmul.f32 0.1, %v1233_v1  ;;  %5695 = vmatmul.mubr.bf16.gmra.mrb[120].mxu0 %v5981_v52  ;;  %5823 = vmatmul.mubr.bf16.gmra.mrb[120].mxu1 %v5982_v53  ;;  %v2466_v13 = vmax.f32 %v1230_v48, %v2210_v63 }
 0x138   :  { %v2339_v10 = vmul.f32 0.1, %v1745_v2  ;;  %v2209_v11 = vmul.f32 0.1, %v1225_v7  ;;  %5698 = vmatprep.mubr.bf16.mxu0 %v5983_v61  ;;  %5826 = vmatprep.mubr.bf16.mxu1 %v5984_v62  ;;  %v2594_v14 = vmax.f32 %v1742_v49, %v2338_v0  ;;  %v2464_v17 = vmax.f32 %v1222_v57, %v2208_v5 }
 0x139   :  { %v2337_v12 = vmul.f32 0.1, %v1737_v8  ;;  %v2467_v15 = vmax.f32 %v1233_v1, %v2211_v9  ;;  %v2592_v18 = vmax.f32 %v1734_v58, %v2336_v6 }
 0x13a   :  { %v2595_v16 = vmax.f32 %v1745_v2, %v2339_v10  ;;  %v2465_v19 = vmax.f32 %v1225_v7, %v2209_v11  ;;  %v5592_v21 = vpop.f32.mrb[16].mxu0  ;;  %v5720_v22 = vpop.f32.mrb[16].mxu1 }
 0x13b   :  { %v2593_v20 = vmax.f32 %v1737_v8, %v2337_v12  ;;  %v4693_v23 = vpack.c.bf16 %v2467_v15, %v2466_v13  ;;  %v1246_v25 = vadd.f32 %v5592_v21, %v6119_v54  ;;  %v1758_v26 = vadd.f32 %v5720_v22, %v6119_v54  ;;  %v1237_v27 = vpop.f32.mrb[17].mxu0  ;;  %v1749_v28 = vpop.f32.mrb[17].mxu1 }
 0x13c   :  { %v5013_v24 = vpack.c.bf16 %v2595_v16, %v2594_v14  ;;  %v4688_v31 = vpack.c.bf16 %v2465_v19, %v2464_v17  ;;  %v1238_v33 = vadd.f32 %v6119_v54, %v1237_v27  ;;  %v1750_v34 = vadd.f32 %v6119_v54, %v1749_v28  ;;  %v5593_v35 = vpop.f32.mrb[18].mxu0  ;;  %v5721_v36 = vpop.f32.mrb[18].mxu1 }
 0x13d   :  { %v5008_v32 = vpack.c.bf16 %v2593_v20, %v2592_v18  ;;  %5301 = vst [vmem:[#allocation7 + $0x38] sm:$0xff] %v4693_v23   ;;  %v2214_v37 = vmul.f32 0.1, %v1246_v25  ;;  %v2342_v38 = vmul.f32 0.1, %v1758_v26  ;;  %v1249_v39 = vadd.f32 %v5593_v35, %v6119_v54  ;;  %v1240_v41 = vpop.f32.mrb[19].mxu0 }
 0x13e   :  { %5365 = vst [vmem:[#allocation7 + $0x238] sm:$0xff] %v5013_v24   ;;  %v1761_v40 = vadd.f32 %v5721_v36, %v6119_v54  ;;  %v1752_v42 = vpop.f32.mrb[19].mxu1  ;;  %5300 = vst [vmem:[#allocation7 + $0x30] sm:$0xff] %v4688_v31   ;;  %v2212_v43 = vmul.f32 0.1, %v1238_v33  ;;  %v1241_v45 = vadd.f32 %v6119_v54, %v1240_v41 }
 0x13f   :  { %5364 = vst [vmem:[#allocation7 + $0x230] sm:$0xff] %v5008_v32   ;;  %v2340_v44 = vmul.f32 0.1, %v1750_v34  ;;  %v1753_v46 = vadd.f32 %v6119_v54, %v1752_v42  ;;  %v2215_v47 = vmul.f32 0.1, %v1249_v39  ;;  %5699 = vmatmul.mubr.bf16.gmra.mrb[124].mxu0 %v5985_v29  ;;  %5827 = vmatmul.mubr.bf16.gmra.mrb[124].mxu1 %v5986_v30  ;;  %v2470_v51 = vmax.f32 %v1246_v25, %v2214_v37 }
 0x140   :  { %v2343_v48 = vmul.f32 0.1, %v1761_v40  ;;  %v2213_v49 = vmul.f32 0.1, %v1241_v45  ;;  %v2598_v52 = vmax.f32 %v1758_v26, %v2342_v38  ;;  %v2468_v56 = vmax.f32 %v1238_v33, %v2212_v43 }
 0x141   :  { %v2341_v50 = vmul.f32 0.1, %v1753_v46  ;;  %v2471_v53 = vmax.f32 %v1249_v39, %v2215_v47  ;;  %v2596_v57 = vmax.f32 %v1750_v34, %v2340_v44 }
 0x142   :  { %v2599_v55 = vmax.f32 %v1761_v40, %v2343_v48  ;;  %v2469_v58 = vmax.f32 %v1241_v45, %v2213_v49  ;;  %v5596_v60 = vpop.f32.mrb[20].mxu0  ;;  %v5724_v61 = vpop.f32.mrb[20].mxu1 }
 0x143   :  { %v2597_v59 = vmax.f32 %v1753_v46, %v2341_v50  ;;  %v4703_v62 = vpack.c.bf16 %v2471_v53, %v2470_v51  ;;  %v1262_v0 = vadd.f32 %v5596_v60, %v6119_v54  ;;  %v1774_v1 = vadd.f32 %v5724_v61, %v6119_v54  ;;  %v1253_v2 = vpop.f32.mrb[21].mxu0  ;;  %v1765_v3 = vpop.f32.mrb[21].mxu1 }
 0x144   :  { %v5023_v63 = vpack.c.bf16 %v2599_v55, %v2598_v52  ;;  %v4698_v4 = vpack.c.bf16 %v2469_v58, %v2468_v56  ;;  %v1254_v6 = vadd.f32 %v6119_v54, %v1253_v2  ;;  %v1766_v7 = vadd.f32 %v6119_v54, %v1765_v3  ;;  %v5597_v8 = vpop.f32.mrb[22].mxu0  ;;  %v5725_v9 = vpop.f32.mrb[22].mxu1 }
 0x145   :  { %v5018_v5 = vpack.c.bf16 %v2597_v59, %v2596_v57  ;;  %5303 = vst [vmem:[#allocation7 + $0x48] sm:$0xff] %v4703_v62   ;;  %v2218_v10 = vmul.f32 0.1, %v1262_v0  ;;  %v2346_v11 = vmul.f32 0.1, %v1774_v1  ;;  %v1265_v12 = vadd.f32 %v5597_v8, %v6119_v54  ;;  %v1256_v14 = vpop.f32.mrb[23].mxu0 }
 0x146   :  { %5367 = vst [vmem:[#allocation7 + $0x248] sm:$0xff] %v5023_v63   ;;  %v1777_v13 = vadd.f32 %v5725_v9, %v6119_v54  ;;  %v1768_v15 = vpop.f32.mrb[23].mxu1  ;;  %5302 = vst [vmem:[#allocation7 + $0x40] sm:$0xff] %v4698_v4   ;;  %v2216_v16 = vmul.f32 0.1, %v1254_v6  ;;  %v1257_v18 = vadd.f32 %v6119_v54, %v1256_v14 }
 0x147   :  { %5366 = vst [vmem:[#allocation7 + $0x240] sm:$0xff] %v5018_v5   ;;  %v2344_v17 = vmul.f32 0.1, %v1766_v7  ;;  %v1769_v19 = vadd.f32 %v6119_v54, %v1768_v15  ;;  %v2219_v20 = vmul.f32 0.1, %v1265_v12  ;;  %v2474_v24 = vmax.f32 %v1262_v0, %v2218_v10 }
 0x148   :  { %v2347_v21 = vmul.f32 0.1, %v1777_v13  ;;  %v2217_v22 = vmul.f32 0.1, %v1257_v18  ;;  %v2602_v25 = vmax.f32 %v1774_v1, %v2346_v11  ;;  %v2472_v28 = vmax.f32 %v1254_v6, %v2216_v16 }
 0x149   :  { %v2345_v23 = vmul.f32 0.1, %v1769_v19  ;;  %v2475_v26 = vmax.f32 %v1265_v12, %v2219_v20  ;;  %v2600_v29 = vmax.f32 %v1766_v7, %v2344_v17 }
 0x14a   :  { %v2603_v27 = vmax.f32 %v1777_v13, %v2347_v21  ;;  %v2473_v30 = vmax.f32 %v1257_v18, %v2217_v22  ;;  %v5600_v32 = vpop.f32.mrb[24].mxu0  ;;  %v5728_v33 = vpop.f32.mrb[24].mxu1 }
 0x14b   :  { %v2601_v31 = vmax.f32 %v1769_v19, %v2345_v23  ;;  %v4713_v34 = vpack.c.bf16 %v2475_v26, %v2474_v24  ;;  %v1278_v36 = vadd.f32 %v5600_v32, %v6119_v54  ;;  %v1790_v37 = vadd.f32 %v5728_v33, %v6119_v54  ;;  %v1269_v38 = vpop.f32.mrb[25].mxu0  ;;  %v1781_v39 = vpop.f32.mrb[25].mxu1 }
 0x14c   :  { %v5033_v35 = vpack.c.bf16 %v2603_v27, %v2602_v25  ;;  %v4708_v40 = vpack.c.bf16 %v2473_v30, %v2472_v28  ;;  %v1270_v42 = vadd.f32 %v6119_v54, %v1269_v38  ;;  %v1782_v43 = vadd.f32 %v6119_v54, %v1781_v39  ;;  %v5601_v44 = vpop.f32.mrb[26].mxu0  ;;  %v5729_v45 = vpop.f32.mrb[26].mxu1 }
 0x14d   :  { %v5028_v41 = vpack.c.bf16 %v2601_v31, %v2600_v29  ;;  %5305 = vst [vmem:[#allocation7 + $0x58] sm:$0xff] %v4713_v34   ;;  %v2222_v46 = vmul.f32 0.1, %v1278_v36  ;;  %v2350_v47 = vmul.f32 0.1, %v1790_v37  ;;  %v1281_v48 = vadd.f32 %v5601_v44, %v6119_v54  ;;  %v1272_v50 = vpop.f32.mrb[27].mxu0 }
 0x14e   :  { %5369 = vst [vmem:[#allocation7 + $0x258] sm:$0xff] %v5033_v35   ;;  %v1793_v49 = vadd.f32 %v5729_v45, %v6119_v54  ;;  %v1784_v51 = vpop.f32.mrb[27].mxu1  ;;  %5304 = vst [vmem:[#allocation7 + $0x50] sm:$0xff] %v4708_v40   ;;  %v2220_v52 = vmul.f32 0.1, %v1270_v42  ;;  %v1273_v55 = vadd.f32 %v6119_v54, %v1272_v50 }
 0x14f   :  { %5368 = vst [vmem:[#allocation7 + $0x250] sm:$0xff] %v5028_v41   ;;  %v2348_v53 = vmul.f32 0.1, %v1782_v43  ;;  %v1785_v56 = vadd.f32 %v6119_v54, %v1784_v51  ;;  %v2223_v57 = vmul.f32 0.1, %v1281_v48  ;;  %v2478_v61 = vmax.f32 %v1278_v36, %v2222_v46 }
 0x150   :  { %v2351_v58 = vmul.f32 0.1, %v1793_v49  ;;  %v2221_v59 = vmul.f32 0.1, %v1273_v55  ;;  %v2606_v62 = vmax.f32 %v1790_v37, %v2350_v47  ;;  %v2476_v1 = vmax.f32 %v1270_v42, %v2220_v52 }
 0x151   :  { %v2349_v60 = vmul.f32 0.1, %v1785_v56  ;;  %v2479_v63 = vmax.f32 %v1281_v48, %v2223_v57  ;;  %v2604_v2 = vmax.f32 %v1782_v43, %v2348_v53 }
 0x152   :  { %v2607_v0 = vmax.f32 %v1793_v49, %v2351_v58  ;;  %v2477_v3 = vmax.f32 %v1273_v55, %v2221_v59  ;;  %v5604_v5 = vpop.f32.mrb[28].mxu0  ;;  %v5732_v6 = vpop.f32.mrb[28].mxu1 }
 0x153   :  { %v2605_v4 = vmax.f32 %v1785_v56, %v2349_v60  ;;  %v4723_v7 = vpack.c.bf16 %v2479_v63, %v2478_v61  ;;  %v1294_v9 = vadd.f32 %v5604_v5, %v6119_v54  ;;  %v1806_v10 = vadd.f32 %v5732_v6, %v6119_v54  ;;  %v1285_v11 = vpop.f32.mrb[29].mxu0  ;;  %v1797_v12 = vpop.f32.mrb[29].mxu1 }
 0x154   :  { %v5043_v8 = vpack.c.bf16 %v2607_v0, %v2606_v62  ;;  %v4718_v13 = vpack.c.bf16 %v2477_v3, %v2476_v1  ;;  %v1286_v15 = vadd.f32 %v6119_v54, %v1285_v11  ;;  %v1798_v16 = vadd.f32 %v6119_v54, %v1797_v12  ;;  %v5605_v17 = vpop.f32.mrb[30].mxu0  ;;  %v5733_v18 = vpop.f32.mrb[30].mxu1 }
 0x155   :  { %v5038_v14 = vpack.c.bf16 %v2605_v4, %v2604_v2  ;;  %5307 = vst [vmem:[#allocation7 + $0x68] sm:$0xff] %v4723_v7   ;;  %v2226_v19 = vmul.f32 0.1, %v1294_v9  ;;  %v2354_v20 = vmul.f32 0.1, %v1806_v10  ;;  %v1297_v21 = vadd.f32 %v5605_v17, %v6119_v54  ;;  %v1288_v23 = vpop.f32.mrb[31].mxu0 }
 0x156   :  { %5371 = vst [vmem:[#allocation7 + $0x268] sm:$0xff] %v5043_v8   ;;  %v1809_v22 = vadd.f32 %v5733_v18, %v6119_v54  ;;  %v1800_v24 = vpop.f32.mrb[31].mxu1  ;;  %5306 = vst [vmem:[#allocation7 + $0x60] sm:$0xff] %v4718_v13   ;;  %v2224_v25 = vmul.f32 0.1, %v1286_v15  ;;  %v1289_v27 = vadd.f32 %v6119_v54, %v1288_v23 }
 0x157   :  { %5370 = vst [vmem:[#allocation7 + $0x260] sm:$0xff] %v5038_v14   ;;  %v2352_v26 = vmul.f32 0.1, %v1798_v16  ;;  %v1801_v28 = vadd.f32 %v6119_v54, %v1800_v24  ;;  %v2227_v29 = vmul.f32 0.1, %v1297_v21  ;;  %v2482_v33 = vmax.f32 %v1294_v9, %v2226_v19 }
 0x158   :  { %v2355_v30 = vmul.f32 0.1, %v1809_v22  ;;  %v2225_v31 = vmul.f32 0.1, %v1289_v27  ;;  %v2610_v34 = vmax.f32 %v1806_v10, %v2354_v20  ;;  %v2480_v37 = vmax.f32 %v1286_v15, %v2224_v25 }
 0x159   :  { %v2353_v32 = vmul.f32 0.1, %v1801_v28  ;;  %v2483_v35 = vmax.f32 %v1297_v21, %v2227_v29  ;;  %v2608_v38 = vmax.f32 %v1798_v16, %v2352_v26 }
 0x15a   :  { %v2611_v36 = vmax.f32 %v1809_v22, %v2355_v30  ;;  %v2481_v39 = vmax.f32 %v1289_v27, %v2225_v31  ;;  %v5608_v41 = vpop.f32.mrb[32].mxu0  ;;  %v5736_v42 = vpop.f32.mrb[32].mxu1 }
 0x15b   :  { %v2609_v40 = vmax.f32 %v1801_v28, %v2353_v32  ;;  %v4733_v43 = vpack.c.bf16 %v2483_v35, %v2482_v33  ;;  %v1310_v45 = vadd.f32 %v5608_v41, %v6119_v54  ;;  %v1822_v46 = vadd.f32 %v5736_v42, %v6119_v54  ;;  %v1301_v47 = vpop.f32.mrb[33].mxu0  ;;  %v1813_v48 = vpop.f32.mrb[33].mxu1 }
 0x15c   :  { %v5053_v44 = vpack.c.bf16 %v2611_v36, %v2610_v34  ;;  %v4728_v49 = vpack.c.bf16 %v2481_v39, %v2480_v37  ;;  %v1302_v51 = vadd.f32 %v6119_v54, %v1301_v47  ;;  %v1814_v52 = vadd.f32 %v6119_v54, %v1813_v48  ;;  %v5609_v53 = vpop.f32.mrb[34].mxu0  ;;  %v5737_v55 = vpop.f32.mrb[34].mxu1 }
 0x15d   :  { %v5048_v50 = vpack.c.bf16 %v2609_v40, %v2608_v38  ;;  %5309 = vst [vmem:[#allocation7 + $0x78] sm:$0xff] %v4733_v43   ;;  %v2230_v56 = vmul.f32 0.1, %v1310_v45  ;;  %v2358_v57 = vmul.f32 0.1, %v1822_v46  ;;  %v1313_v58 = vadd.f32 %v5609_v53, %v6119_v54  ;;  %v1304_v60 = vpop.f32.mrb[35].mxu0 }
 0x15e   :  { %5373 = vst [vmem:[#allocation7 + $0x278] sm:$0xff] %v5053_v44   ;;  %v1825_v59 = vadd.f32 %v5737_v55, %v6119_v54  ;;  %v1816_v61 = vpop.f32.mrb[35].mxu1  ;;  %5308 = vst [vmem:[#allocation7 + $0x70] sm:$0xff] %v4728_v49   ;;  %v2228_v62 = vmul.f32 0.1, %v1302_v51  ;;  %v1305_v0 = vadd.f32 %v6119_v54, %v1304_v60 }
 0x15f   :  { %5372 = vst [vmem:[#allocation7 + $0x270] sm:$0xff] %v5048_v50   ;;  %v2356_v63 = vmul.f32 0.1, %v1814_v52  ;;  %v1817_v1 = vadd.f32 %v6119_v54, %v1816_v61  ;;  %v2231_v2 = vmul.f32 0.1, %v1313_v58  ;;  %v2486_v6 = vmax.f32 %v1310_v45, %v2230_v56 }
 0x160   :  { %v2359_v3 = vmul.f32 0.1, %v1825_v59  ;;  %v2229_v4 = vmul.f32 0.1, %v1305_v0  ;;  %v2614_v7 = vmax.f32 %v1822_v46, %v2358_v57  ;;  %v2484_v10 = vmax.f32 %v1302_v51, %v2228_v62 }
 0x161   :  { %v2357_v5 = vmul.f32 0.1, %v1817_v1  ;;  %v2487_v8 = vmax.f32 %v1313_v58, %v2231_v2  ;;  %v2612_v11 = vmax.f32 %v1814_v52, %v2356_v63 }
 0x162   :  { %v2615_v9 = vmax.f32 %v1825_v59, %v2359_v3  ;;  %v2485_v12 = vmax.f32 %v1305_v0, %v2229_v4  ;;  %v5612_v14 = vpop.f32.mrb[36].mxu0  ;;  %v5740_v15 = vpop.f32.mrb[36].mxu1 }
 0x163   :  { %v2613_v13 = vmax.f32 %v1817_v1, %v2357_v5  ;;  %v4743_v16 = vpack.c.bf16 %v2487_v8, %v2486_v6  ;;  %v1326_v18 = vadd.f32 %v5612_v14, %v6119_v54  ;;  %v1838_v19 = vadd.f32 %v5740_v15, %v6119_v54  ;;  %v1317_v20 = vpop.f32.mrb[37].mxu0  ;;  %v1829_v21 = vpop.f32.mrb[37].mxu1 }
 0x164   :  { %v5063_v17 = vpack.c.bf16 %v2615_v9, %v2614_v7  ;;  %v4738_v22 = vpack.c.bf16 %v2485_v12, %v2484_v10  ;;  %v1318_v24 = vadd.f32 %v6119_v54, %v1317_v20  ;;  %v1830_v25 = vadd.f32 %v6119_v54, %v1829_v21  ;;  %v5613_v26 = vpop.f32.mrb[38].mxu0  ;;  %v5741_v27 = vpop.f32.mrb[38].mxu1 }
 0x165   :  { %v5058_v23 = vpack.c.bf16 %v2613_v13, %v2612_v11  ;;  %5311 = vst [vmem:[#allocation7 + $0x88] sm:$0xff] %v4743_v16   ;;  %v2234_v28 = vmul.f32 0.1, %v1326_v18  ;;  %v2362_v29 = vmul.f32 0.1, %v1838_v19  ;;  %v1329_v30 = vadd.f32 %v5613_v26, %v6119_v54  ;;  %v1320_v32 = vpop.f32.mrb[39].mxu0 }
 0x166   :  { %5375 = vst [vmem:[#allocation7 + $0x288] sm:$0xff] %v5063_v17   ;;  %v1841_v31 = vadd.f32 %v5741_v27, %v6119_v54  ;;  %v1832_v33 = vpop.f32.mrb[39].mxu1  ;;  %5310 = vst [vmem:[#allocation7 + $0x80] sm:$0xff] %v4738_v22   ;;  %v2232_v34 = vmul.f32 0.1, %v1318_v24  ;;  %v1321_v36 = vadd.f32 %v6119_v54, %v1320_v32 }
 0x167   :  { %5374 = vst [vmem:[#allocation7 + $0x280] sm:$0xff] %v5058_v23   ;;  %v2360_v35 = vmul.f32 0.1, %v1830_v25  ;;  %v1833_v37 = vadd.f32 %v6119_v54, %v1832_v33  ;;  %v2235_v38 = vmul.f32 0.1, %v1329_v30  ;;  %v2490_v42 = vmax.f32 %v1326_v18, %v2234_v28 }
 0x168   :  { %v2363_v39 = vmul.f32 0.1, %v1841_v31  ;;  %v2233_v40 = vmul.f32 0.1, %v1321_v36  ;;  %v2618_v43 = vmax.f32 %v1838_v19, %v2362_v29  ;;  %v2488_v46 = vmax.f32 %v1318_v24, %v2232_v34 }
 0x169   :  { %v2361_v41 = vmul.f32 0.1, %v1833_v37  ;;  %v2491_v44 = vmax.f32 %v1329_v30, %v2235_v38  ;;  %v2616_v47 = vmax.f32 %v1830_v25, %v2360_v35 }
 0x16a   :  { %v2619_v45 = vmax.f32 %v1841_v31, %v2363_v39  ;;  %v2489_v48 = vmax.f32 %v1321_v36, %v2233_v40  ;;  %v5616_v50 = vpop.f32.mrb[40].mxu0  ;;  %v5744_v51 = vpop.f32.mrb[40].mxu1 }
 0x16b   :  { %v2617_v49 = vmax.f32 %v1833_v37, %v2361_v41  ;;  %v4753_v52 = vpack.c.bf16 %v2491_v44, %v2490_v42  ;;  %v1342_v55 = vadd.f32 %v5616_v50, %v6119_v54  ;;  %v1854_v56 = vadd.f32 %v5744_v51, %v6119_v54  ;;  %v1333_v57 = vpop.f32.mrb[41].mxu0  ;;  %v1845_v58 = vpop.f32.mrb[41].mxu1 }
 0x16c   :  { %v5073_v53 = vpack.c.bf16 %v2619_v45, %v2618_v43  ;;  %v4748_v59 = vpack.c.bf16 %v2489_v48, %v2488_v46  ;;  %v1334_v61 = vadd.f32 %v6119_v54, %v1333_v57  ;;  %v1846_v62 = vadd.f32 %v6119_v54, %v1845_v58  ;;  %v5617_v63 = vpop.f32.mrb[42].mxu0  ;;  %v5745_v0 = vpop.f32.mrb[42].mxu1 }
 0x16d   :  { %v5068_v60 = vpack.c.bf16 %v2617_v49, %v2616_v47  ;;  %5313 = vst [vmem:[#allocation7 + $0x98] sm:$0xff] %v4753_v52   ;;  %v2238_v1 = vmul.f32 0.1, %v1342_v55  ;;  %v2366_v2 = vmul.f32 0.1, %v1854_v56  ;;  %v1345_v3 = vadd.f32 %v5617_v63, %v6119_v54  ;;  %v1336_v5 = vpop.f32.mrb[43].mxu0 }
 0x16e   :  { %5377 = vst [vmem:[#allocation7 + $0x298] sm:$0xff] %v5073_v53   ;;  %v1857_v4 = vadd.f32 %v5745_v0, %v6119_v54  ;;  %v1848_v6 = vpop.f32.mrb[43].mxu1  ;;  %5312 = vst [vmem:[#allocation7 + $0x90] sm:$0xff] %v4748_v59   ;;  %v2236_v7 = vmul.f32 0.1, %v1334_v61  ;;  %v1337_v9 = vadd.f32 %v6119_v54, %v1336_v5 }
 0x16f   :  { %5376 = vst [vmem:[#allocation7 + $0x290] sm:$0xff] %v5068_v60   ;;  %v2364_v8 = vmul.f32 0.1, %v1846_v62  ;;  %v1849_v10 = vadd.f32 %v6119_v54, %v1848_v6  ;;  %v2239_v11 = vmul.f32 0.1, %v1345_v3  ;;  %v2494_v15 = vmax.f32 %v1342_v55, %v2238_v1 }
 0x170   :  { %v2367_v12 = vmul.f32 0.1, %v1857_v4  ;;  %v2237_v13 = vmul.f32 0.1, %v1337_v9  ;;  %v2622_v16 = vmax.f32 %v1854_v56, %v2366_v2  ;;  %v2492_v19 = vmax.f32 %v1334_v61, %v2236_v7 }
 0x171   :  { %v2365_v14 = vmul.f32 0.1, %v1849_v10  ;;  %v2495_v17 = vmax.f32 %v1345_v3, %v2239_v11  ;;  %v2620_v20 = vmax.f32 %v1846_v62, %v2364_v8 }
 0x172   :  { %v2623_v18 = vmax.f32 %v1857_v4, %v2367_v12  ;;  %v2493_v21 = vmax.f32 %v1337_v9, %v2237_v13  ;;  %v5620_v23 = vpop.f32.mrb[44].mxu0  ;;  %v5748_v24 = vpop.f32.mrb[44].mxu1 }
 0x173   :  { %v2621_v22 = vmax.f32 %v1849_v10, %v2365_v14  ;;  %v4763_v25 = vpack.c.bf16 %v2495_v17, %v2494_v15  ;;  %v1358_v27 = vadd.f32 %v5620_v23, %v6119_v54  ;;  %v1870_v28 = vadd.f32 %v5748_v24, %v6119_v54  ;;  %v1349_v29 = vpop.f32.mrb[45].mxu0  ;;  %v1861_v30 = vpop.f32.mrb[45].mxu1 }
 0x174   :  { %v5083_v26 = vpack.c.bf16 %v2623_v18, %v2622_v16  ;;  %v4758_v31 = vpack.c.bf16 %v2493_v21, %v2492_v19  ;;  %v1350_v33 = vadd.f32 %v6119_v54, %v1349_v29  ;;  %v1862_v34 = vadd.f32 %v6119_v54, %v1861_v30  ;;  %v5621_v35 = vpop.f32.mrb[46].mxu0  ;;  %v5749_v36 = vpop.f32.mrb[46].mxu1 }
 0x175   :  { %v5078_v32 = vpack.c.bf16 %v2621_v22, %v2620_v20  ;;  %5315 = vst [vmem:[#allocation7 + $0xa8] sm:$0xff] %v4763_v25   ;;  %v2242_v37 = vmul.f32 0.1, %v1358_v27  ;;  %v2370_v38 = vmul.f32 0.1, %v1870_v28  ;;  %v1361_v39 = vadd.f32 %v5621_v35, %v6119_v54  ;;  %v1352_v41 = vpop.f32.mrb[47].mxu0 }
 0x176   :  { %5379 = vst [vmem:[#allocation7 + $0x2a8] sm:$0xff] %v5083_v26   ;;  %v1873_v40 = vadd.f32 %v5749_v36, %v6119_v54  ;;  %v1864_v42 = vpop.f32.mrb[47].mxu1  ;;  %5314 = vst [vmem:[#allocation7 + $0xa0] sm:$0xff] %v4758_v31   ;;  %v2240_v43 = vmul.f32 0.1, %v1350_v33  ;;  %v1353_v45 = vadd.f32 %v6119_v54, %v1352_v41 }
 0x177   :  { %5378 = vst [vmem:[#allocation7 + $0x2a0] sm:$0xff] %v5078_v32   ;;  %v2368_v44 = vmul.f32 0.1, %v1862_v34  ;;  %v1865_v46 = vadd.f32 %v6119_v54, %v1864_v42  ;;  %v2243_v47 = vmul.f32 0.1, %v1361_v39  ;;  %v2498_v51 = vmax.f32 %v1358_v27, %v2242_v37 }
 0x178   :  { %v2371_v48 = vmul.f32 0.1, %v1873_v40  ;;  %v2241_v49 = vmul.f32 0.1, %v1353_v45  ;;  %v2626_v52 = vmax.f32 %v1870_v28, %v2370_v38  ;;  %v2496_v56 = vmax.f32 %v1350_v33, %v2240_v43  ;;  %v6220_v54 = vld [vmem:[%s6404_s2] ss:$0 sm:$0xff] }
 0x179   :  { %v2369_v50 = vmul.f32 0.1, %v1865_v46  ;;  %v2499_v53 = vmax.f32 %v1361_v39, %v2243_v47  ;;  %v2624_v57 = vmax.f32 %v1862_v34, %v2368_v44 }
 0x17a   :  { %v2627_v55 = vmax.f32 %v1873_v40, %v2371_v48  ;;  %v2497_v58 = vmax.f32 %v1353_v45, %v2241_v49  ;;  %v5624_v60 = vpop.f32.mrb[48].mxu0  ;;  %v5752_v61 = vpop.f32.mrb[48].mxu1 }
 0x17b   :  { %v2625_v59 = vmax.f32 %v1865_v46, %v2369_v50  ;;  %v4773_v62 = vpack.c.bf16 %v2499_v53, %v2498_v51  ;;  %v1374_v0 = vadd.f32 %v6220_v54, %v5624_v60  ;;  %v1886_v1 = vadd.f32 %v6220_v54, %v5752_v61  ;;  %v1365_v2 = vpop.f32.mrb[49].mxu0  ;;  %v1877_v3 = vpop.f32.mrb[49].mxu1 }
 0x17c   :  { %v5093_v63 = vpack.c.bf16 %v2627_v55, %v2626_v52  ;;  %v4768_v4 = vpack.c.bf16 %v2497_v58, %v2496_v56  ;;  %v1366_v6 = vadd.f32 %v6220_v54, %v1365_v2  ;;  %v1878_v7 = vadd.f32 %v6220_v54, %v1877_v3  ;;  %v5625_v8 = vpop.f32.mrb[50].mxu0  ;;  %v5753_v9 = vpop.f32.mrb[50].mxu1 }
 0x17d   :  { %v5088_v5 = vpack.c.bf16 %v2625_v59, %v2624_v57  ;;  %5317 = vst [vmem:[#allocation7 + $0xb8] sm:$0xff] %v4773_v62   ;;  %v2246_v10 = vmul.f32 0.1, %v1374_v0  ;;  %v2374_v11 = vmul.f32 0.1, %v1886_v1  ;;  %v1377_v12 = vadd.f32 %v6220_v54, %v5625_v8  ;;  %v1368_v14 = vpop.f32.mrb[51].mxu0 }
 0x17e   :  { %5381 = vst [vmem:[#allocation7 + $0x2b8] sm:$0xff] %v5093_v63   ;;  %v1889_v13 = vadd.f32 %v6220_v54, %v5753_v9  ;;  %v1880_v15 = vpop.f32.mrb[51].mxu1  ;;  %5316 = vst [vmem:[#allocation7 + $0xb0] sm:$0xff] %v4768_v4   ;;  %v2244_v16 = vmul.f32 0.1, %v1366_v6  ;;  %v1369_v18 = vadd.f32 %v6220_v54, %v1368_v14 }
 0x17f   :  { %5380 = vst [vmem:[#allocation7 + $0x2b0] sm:$0xff] %v5088_v5   ;;  %v2372_v17 = vmul.f32 0.1, %v1878_v7  ;;  %v1881_v19 = vadd.f32 %v6220_v54, %v1880_v15  ;;  %v2247_v20 = vmul.f32 0.1, %v1377_v12  ;;  %v2502_v24 = vmax.f32 %v1374_v0, %v2246_v10 }
 0x180   :  { %v2375_v21 = vmul.f32 0.1, %v1889_v13  ;;  %v2245_v22 = vmul.f32 0.1, %v1369_v18  ;;  %v2630_v25 = vmax.f32 %v1886_v1, %v2374_v11  ;;  %v2500_v28 = vmax.f32 %v1366_v6, %v2244_v16 }
 0x181   :  { %v2373_v23 = vmul.f32 0.1, %v1881_v19  ;;  %v2503_v26 = vmax.f32 %v1377_v12, %v2247_v20  ;;  %v2628_v29 = vmax.f32 %v1878_v7, %v2372_v17 }
 0x182   :  { %v2631_v27 = vmax.f32 %v1889_v13, %v2375_v21  ;;  %v2501_v30 = vmax.f32 %v1369_v18, %v2245_v22  ;;  %v5628_v32 = vpop.f32.mrb[52].mxu0  ;;  %v5756_v33 = vpop.f32.mrb[52].mxu1 }
 0x183   :  { %v2629_v31 = vmax.f32 %v1881_v19, %v2373_v23  ;;  %v4783_v34 = vpack.c.bf16 %v2503_v26, %v2502_v24  ;;  %v1390_v36 = vadd.f32 %v6220_v54, %v5628_v32  ;;  %v1902_v37 = vadd.f32 %v6220_v54, %v5756_v33  ;;  %v1381_v38 = vpop.f32.mrb[53].mxu0  ;;  %v1893_v39 = vpop.f32.mrb[53].mxu1 }
 0x184   :  { %v5103_v35 = vpack.c.bf16 %v2631_v27, %v2630_v25  ;;  %v4778_v40 = vpack.c.bf16 %v2501_v30, %v2500_v28  ;;  %v1382_v42 = vadd.f32 %v6220_v54, %v1381_v38  ;;  %v1894_v43 = vadd.f32 %v6220_v54, %v1893_v39  ;;  %v5629_v44 = vpop.f32.mrb[54].mxu0  ;;  %v5757_v45 = vpop.f32.mrb[54].mxu1 }
 0x185   :  { %v5098_v41 = vpack.c.bf16 %v2629_v31, %v2628_v29  ;;  %5319 = vst [vmem:[#allocation7 + $0xc8] sm:$0xff] %v4783_v34   ;;  %v2250_v46 = vmul.f32 0.1, %v1390_v36  ;;  %v2378_v47 = vmul.f32 0.1, %v1902_v37  ;;  %v1393_v48 = vadd.f32 %v6220_v54, %v5629_v44  ;;  %v1384_v50 = vpop.f32.mrb[55].mxu0 }
 0x186   :  { %5383 = vst [vmem:[#allocation7 + $0x2c8] sm:$0xff] %v5103_v35   ;;  %v1905_v49 = vadd.f32 %v6220_v54, %v5757_v45  ;;  %v1896_v51 = vpop.f32.mrb[55].mxu1  ;;  %5318 = vst [vmem:[#allocation7 + $0xc0] sm:$0xff] %v4778_v40   ;;  %v2248_v52 = vmul.f32 0.1, %v1382_v42  ;;  %v1385_v55 = vadd.f32 %v6220_v54, %v1384_v50 }
 0x187   :  { %5382 = vst [vmem:[#allocation7 + $0x2c0] sm:$0xff] %v5098_v41   ;;  %v2376_v53 = vmul.f32 0.1, %v1894_v43  ;;  %v1897_v56 = vadd.f32 %v6220_v54, %v1896_v51  ;;  %v2251_v57 = vmul.f32 0.1, %v1393_v48  ;;  %v2506_v61 = vmax.f32 %v1390_v36, %v2250_v46 }
 0x188   :  { %v2379_v58 = vmul.f32 0.1, %v1905_v49  ;;  %v2249_v59 = vmul.f32 0.1, %v1385_v55  ;;  %v2634_v62 = vmax.f32 %v1902_v37, %v2378_v47  ;;  %v2504_v1 = vmax.f32 %v1382_v42, %v2248_v52 }
 0x189   :  { %v2377_v60 = vmul.f32 0.1, %v1897_v56  ;;  %v2507_v63 = vmax.f32 %v1393_v48, %v2251_v57  ;;  %v2632_v2 = vmax.f32 %v1894_v43, %v2376_v53 }
 0x18a   :  { %v2635_v0 = vmax.f32 %v1905_v49, %v2379_v58  ;;  %v2505_v3 = vmax.f32 %v1385_v55, %v2249_v59  ;;  %v5632_v5 = vpop.f32.mrb[56].mxu0  ;;  %v5760_v6 = vpop.f32.mrb[56].mxu1 }
 0x18b   :  { %v2633_v4 = vmax.f32 %v1897_v56, %v2377_v60  ;;  %v4793_v7 = vpack.c.bf16 %v2507_v63, %v2506_v61  ;;  %v1406_v9 = vadd.f32 %v6220_v54, %v5632_v5  ;;  %v1918_v10 = vadd.f32 %v6220_v54, %v5760_v6  ;;  %v1397_v11 = vpop.f32.mrb[57].mxu0  ;;  %v1909_v12 = vpop.f32.mrb[57].mxu1 }
 0x18c   :  { %v5113_v8 = vpack.c.bf16 %v2635_v0, %v2634_v62  ;;  %v4788_v13 = vpack.c.bf16 %v2505_v3, %v2504_v1  ;;  %v1398_v15 = vadd.f32 %v6220_v54, %v1397_v11  ;;  %v1910_v16 = vadd.f32 %v6220_v54, %v1909_v12  ;;  %v5633_v17 = vpop.f32.mrb[58].mxu0  ;;  %v5761_v18 = vpop.f32.mrb[58].mxu1 }
 0x18d   :  { %v5108_v14 = vpack.c.bf16 %v2633_v4, %v2632_v2  ;;  %5321 = vst [vmem:[#allocation7 + $0xd8] sm:$0xff] %v4793_v7   ;;  %v2254_v19 = vmul.f32 0.1, %v1406_v9  ;;  %v2382_v20 = vmul.f32 0.1, %v1918_v10  ;;  %v1409_v21 = vadd.f32 %v6220_v54, %v5633_v17  ;;  %v1400_v23 = vpop.f32.mrb[59].mxu0 }
 0x18e   :  { %5385 = vst [vmem:[#allocation7 + $0x2d8] sm:$0xff] %v5113_v8   ;;  %v1921_v22 = vadd.f32 %v6220_v54, %v5761_v18  ;;  %v1912_v24 = vpop.f32.mrb[59].mxu1  ;;  %5320 = vst [vmem:[#allocation7 + $0xd0] sm:$0xff] %v4788_v13   ;;  %v2252_v25 = vmul.f32 0.1, %v1398_v15  ;;  %v1401_v27 = vadd.f32 %v6220_v54, %v1400_v23 }
 0x18f   :  { %5384 = vst [vmem:[#allocation7 + $0x2d0] sm:$0xff] %v5108_v14   ;;  %v2380_v26 = vmul.f32 0.1, %v1910_v16  ;;  %v1913_v28 = vadd.f32 %v6220_v54, %v1912_v24  ;;  %v2255_v29 = vmul.f32 0.1, %v1409_v21  ;;  %v2510_v33 = vmax.f32 %v1406_v9, %v2254_v19 }
 0x190   :  { %v2383_v30 = vmul.f32 0.1, %v1921_v22  ;;  %v2253_v31 = vmul.f32 0.1, %v1401_v27  ;;  %v2638_v34 = vmax.f32 %v1918_v10, %v2382_v20  ;;  %v2508_v37 = vmax.f32 %v1398_v15, %v2252_v25 }
 0x191   :  { %v2381_v32 = vmul.f32 0.1, %v1913_v28  ;;  %v2511_v35 = vmax.f32 %v1409_v21, %v2255_v29  ;;  %v2636_v38 = vmax.f32 %v1910_v16, %v2380_v26 }
 0x192   :  { %v2639_v36 = vmax.f32 %v1921_v22, %v2383_v30  ;;  %v2509_v39 = vmax.f32 %v1401_v27, %v2253_v31  ;;  %v5636_v41 = vpop.f32.mrb[60].mxu0  ;;  %v5764_v42 = vpop.f32.mrb[60].mxu1 }
 0x193   :  { %v2637_v40 = vmax.f32 %v1913_v28, %v2381_v32  ;;  %v4803_v43 = vpack.c.bf16 %v2511_v35, %v2510_v33  ;;  %v1422_v45 = vadd.f32 %v6220_v54, %v5636_v41  ;;  %v1934_v46 = vadd.f32 %v6220_v54, %v5764_v42  ;;  %v1413_v47 = vpop.f32.mrb[61].mxu0  ;;  %v1925_v48 = vpop.f32.mrb[61].mxu1 }
 0x194   :  { %v5123_v44 = vpack.c.bf16 %v2639_v36, %v2638_v34  ;;  %v4798_v49 = vpack.c.bf16 %v2509_v39, %v2508_v37  ;;  %v1414_v51 = vadd.f32 %v6220_v54, %v1413_v47  ;;  %v1926_v52 = vadd.f32 %v6220_v54, %v1925_v48  ;;  %v5637_v53 = vpop.f32.mrb[62].mxu0  ;;  %v5765_v55 = vpop.f32.mrb[62].mxu1 }
 0x195   :  { %v5118_v50 = vpack.c.bf16 %v2637_v40, %v2636_v38  ;;  %5323 = vst [vmem:[#allocation7 + $0xe8] sm:$0xff] %v4803_v43   ;;  %v2258_v56 = vmul.f32 0.1, %v1422_v45  ;;  %v2386_v57 = vmul.f32 0.1, %v1934_v46  ;;  %v1425_v58 = vadd.f32 %v6220_v54, %v5637_v53  ;;  %v1416_v60 = vpop.f32.mrb[63].mxu0 }
 0x196   :  { %5387 = vst [vmem:[#allocation7 + $0x2e8] sm:$0xff] %v5123_v44   ;;  %v1937_v59 = vadd.f32 %v6220_v54, %v5765_v55  ;;  %v1928_v61 = vpop.f32.mrb[63].mxu1  ;;  %5322 = vst [vmem:[#allocation7 + $0xe0] sm:$0xff] %v4798_v49   ;;  %v2256_v62 = vmul.f32 0.1, %v1414_v51  ;;  %v1417_v0 = vadd.f32 %v6220_v54, %v1416_v60 }
 0x197   :  { %5386 = vst [vmem:[#allocation7 + $0x2e0] sm:$0xff] %v5118_v50   ;;  %v2384_v63 = vmul.f32 0.1, %v1926_v52  ;;  %v1929_v1 = vadd.f32 %v6220_v54, %v1928_v61  ;;  %v2259_v2 = vmul.f32 0.1, %v1425_v58  ;;  %v2514_v6 = vmax.f32 %v1422_v45, %v2258_v56 }
 0x198   :  { %v2387_v3 = vmul.f32 0.1, %v1937_v59  ;;  %v2257_v4 = vmul.f32 0.1, %v1417_v0  ;;  %v2642_v7 = vmax.f32 %v1934_v46, %v2386_v57  ;;  %v2512_v10 = vmax.f32 %v1414_v51, %v2256_v62 }
 0x199   :  { %v2385_v5 = vmul.f32 0.1, %v1929_v1  ;;  %v2515_v8 = vmax.f32 %v1425_v58, %v2259_v2  ;;  %v2640_v11 = vmax.f32 %v1926_v52, %v2384_v63 }
 0x19a   :  { %v2643_v9 = vmax.f32 %v1937_v59, %v2387_v3  ;;  %v2513_v12 = vmax.f32 %v1417_v0, %v2257_v4  ;;  %v5640_v14 = vpop.f32.mrb[64].mxu0  ;;  %v5768_v15 = vpop.f32.mrb[64].mxu1 }
 0x19b   :  { %v2641_v13 = vmax.f32 %v1929_v1, %v2385_v5  ;;  %v4813_v16 = vpack.c.bf16 %v2515_v8, %v2514_v6  ;;  %v1438_v18 = vadd.f32 %v6220_v54, %v5640_v14  ;;  %v1950_v19 = vadd.f32 %v6220_v54, %v5768_v15  ;;  %v1429_v20 = vpop.f32.mrb[65].mxu0  ;;  %v1941_v21 = vpop.f32.mrb[65].mxu1 }
 0x19c   :  { %v5133_v17 = vpack.c.bf16 %v2643_v9, %v2642_v7  ;;  %v4808_v22 = vpack.c.bf16 %v2513_v12, %v2512_v10  ;;  %v1430_v24 = vadd.f32 %v6220_v54, %v1429_v20  ;;  %v1942_v25 = vadd.f32 %v6220_v54, %v1941_v21  ;;  %v5641_v26 = vpop.f32.mrb[66].mxu0  ;;  %v5769_v27 = vpop.f32.mrb[66].mxu1 }
 0x19d   :  { %v5128_v23 = vpack.c.bf16 %v2641_v13, %v2640_v11  ;;  %5325 = vst [vmem:[#allocation7 + $0xf8] sm:$0xff] %v4813_v16   ;;  %v2262_v28 = vmul.f32 0.1, %v1438_v18  ;;  %v2390_v29 = vmul.f32 0.1, %v1950_v19  ;;  %v1441_v30 = vadd.f32 %v6220_v54, %v5641_v26  ;;  %v1432_v32 = vpop.f32.mrb[67].mxu0 }
 0x19e   :  { %5389 = vst [vmem:[#allocation7 + $0x2f8] sm:$0xff] %v5133_v17   ;;  %v1953_v31 = vadd.f32 %v6220_v54, %v5769_v27  ;;  %v1944_v33 = vpop.f32.mrb[67].mxu1  ;;  %5324 = vst [vmem:[#allocation7 + $0xf0] sm:$0xff] %v4808_v22   ;;  %v2260_v34 = vmul.f32 0.1, %v1430_v24  ;;  %v1433_v36 = vadd.f32 %v6220_v54, %v1432_v32 }
 0x19f   :  { %5388 = vst [vmem:[#allocation7 + $0x2f0] sm:$0xff] %v5128_v23   ;;  %v2388_v35 = vmul.f32 0.1, %v1942_v25  ;;  %v1945_v37 = vadd.f32 %v6220_v54, %v1944_v33  ;;  %v2263_v38 = vmul.f32 0.1, %v1441_v30  ;;  %v2518_v42 = vmax.f32 %v1438_v18, %v2262_v28 }
 0x1a0   :  { %v2391_v39 = vmul.f32 0.1, %v1953_v31  ;;  %v2261_v40 = vmul.f32 0.1, %v1433_v36  ;;  %v2646_v43 = vmax.f32 %v1950_v19, %v2390_v29  ;;  %v2516_v46 = vmax.f32 %v1430_v24, %v2260_v34 }
 0x1a1   :  { %v2389_v41 = vmul.f32 0.1, %v1945_v37  ;;  %v2519_v44 = vmax.f32 %v1441_v30, %v2263_v38  ;;  %v2644_v47 = vmax.f32 %v1942_v25, %v2388_v35 }
 0x1a2   :  { %v2647_v45 = vmax.f32 %v1953_v31, %v2391_v39  ;;  %v2517_v48 = vmax.f32 %v1433_v36, %v2261_v40  ;;  %v5644_v50 = vpop.f32.mrb[68].mxu0  ;;  %v5772_v51 = vpop.f32.mrb[68].mxu1 }
 0x1a3   :  { %v2645_v49 = vmax.f32 %v1945_v37, %v2389_v41  ;;  %v4823_v52 = vpack.c.bf16 %v2519_v44, %v2518_v42  ;;  %v1454_v55 = vadd.f32 %v6220_v54, %v5644_v50  ;;  %v1966_v56 = vadd.f32 %v6220_v54, %v5772_v51  ;;  %v1445_v57 = vpop.f32.mrb[69].mxu0  ;;  %v1957_v58 = vpop.f32.mrb[69].mxu1 }
 0x1a4   :  { %v5143_v53 = vpack.c.bf16 %v2647_v45, %v2646_v43  ;;  %v4818_v59 = vpack.c.bf16 %v2517_v48, %v2516_v46  ;;  %v1446_v61 = vadd.f32 %v6220_v54, %v1445_v57  ;;  %v1958_v62 = vadd.f32 %v6220_v54, %v1957_v58  ;;  %v5645_v63 = vpop.f32.mrb[70].mxu0  ;;  %v5773_v0 = vpop.f32.mrb[70].mxu1 }
 0x1a5   :  { %v5138_v60 = vpack.c.bf16 %v2645_v49, %v2644_v47  ;;  %5327 = vst [vmem:[#allocation7 + $0x108] sm:$0xff] %v4823_v52   ;;  %v2266_v1 = vmul.f32 0.1, %v1454_v55  ;;  %v2394_v2 = vmul.f32 0.1, %v1966_v56  ;;  %v1457_v3 = vadd.f32 %v6220_v54, %v5645_v63  ;;  %v1448_v5 = vpop.f32.mrb[71].mxu0 }
 0x1a6   :  { %5391 = vst [vmem:[#allocation7 + $0x308] sm:$0xff] %v5143_v53   ;;  %v1969_v4 = vadd.f32 %v6220_v54, %v5773_v0  ;;  %v1960_v6 = vpop.f32.mrb[71].mxu1  ;;  %5326 = vst [vmem:[#allocation7 + $0x100] sm:$0xff] %v4818_v59   ;;  %v2264_v7 = vmul.f32 0.1, %v1446_v61  ;;  %v1449_v9 = vadd.f32 %v6220_v54, %v1448_v5 }
 0x1a7   :  { %5390 = vst [vmem:[#allocation7 + $0x300] sm:$0xff] %v5138_v60   ;;  %v2392_v8 = vmul.f32 0.1, %v1958_v62  ;;  %v1961_v10 = vadd.f32 %v6220_v54, %v1960_v6  ;;  %v2267_v11 = vmul.f32 0.1, %v1457_v3  ;;  %v2522_v15 = vmax.f32 %v1454_v55, %v2266_v1 }
 0x1a8   :  { %v2395_v12 = vmul.f32 0.1, %v1969_v4  ;;  %v2265_v13 = vmul.f32 0.1, %v1449_v9  ;;  %v2650_v16 = vmax.f32 %v1966_v56, %v2394_v2  ;;  %v2520_v19 = vmax.f32 %v1446_v61, %v2264_v7 }
 0x1a9   :  { %v2393_v14 = vmul.f32 0.1, %v1961_v10  ;;  %v2523_v17 = vmax.f32 %v1457_v3, %v2267_v11  ;;  %v2648_v20 = vmax.f32 %v1958_v62, %v2392_v8 }
 0x1aa   :  { %v2651_v18 = vmax.f32 %v1969_v4, %v2395_v12  ;;  %v2521_v21 = vmax.f32 %v1449_v9, %v2265_v13  ;;  %v5648_v23 = vpop.f32.mrb[72].mxu0  ;;  %v5776_v24 = vpop.f32.mrb[72].mxu1 }
 0x1ab   :  { %v2649_v22 = vmax.f32 %v1961_v10, %v2393_v14  ;;  %v4833_v25 = vpack.c.bf16 %v2523_v17, %v2522_v15  ;;  %v1470_v27 = vadd.f32 %v6220_v54, %v5648_v23  ;;  %v1982_v28 = vadd.f32 %v6220_v54, %v5776_v24  ;;  %v1461_v29 = vpop.f32.mrb[73].mxu0  ;;  %v1973_v30 = vpop.f32.mrb[73].mxu1 }
 0x1ac   :  { %v5153_v26 = vpack.c.bf16 %v2651_v18, %v2650_v16  ;;  %v4828_v31 = vpack.c.bf16 %v2521_v21, %v2520_v19  ;;  %v1462_v33 = vadd.f32 %v6220_v54, %v1461_v29  ;;  %v1974_v34 = vadd.f32 %v6220_v54, %v1973_v30  ;;  %v5649_v35 = vpop.f32.mrb[74].mxu0  ;;  %v5777_v36 = vpop.f32.mrb[74].mxu1 }
 0x1ad   :  { %v5148_v32 = vpack.c.bf16 %v2649_v22, %v2648_v20  ;;  %5329 = vst [vmem:[#allocation7 + $0x118] sm:$0xff] %v4833_v25   ;;  %v2270_v37 = vmul.f32 0.1, %v1470_v27  ;;  %v2398_v38 = vmul.f32 0.1, %v1982_v28  ;;  %v1473_v39 = vadd.f32 %v6220_v54, %v5649_v35  ;;  %v1464_v41 = vpop.f32.mrb[75].mxu0 }
 0x1ae   :  { %5393 = vst [vmem:[#allocation7 + $0x318] sm:$0xff] %v5153_v26   ;;  %v1985_v40 = vadd.f32 %v6220_v54, %v5777_v36  ;;  %v1976_v42 = vpop.f32.mrb[75].mxu1  ;;  %5328 = vst [vmem:[#allocation7 + $0x110] sm:$0xff] %v4828_v31   ;;  %v2268_v43 = vmul.f32 0.1, %v1462_v33  ;;  %v1465_v45 = vadd.f32 %v6220_v54, %v1464_v41 }
 0x1af   :  { %5392 = vst [vmem:[#allocation7 + $0x310] sm:$0xff] %v5148_v32   ;;  %v2396_v44 = vmul.f32 0.1, %v1974_v34  ;;  %v1977_v46 = vadd.f32 %v6220_v54, %v1976_v42  ;;  %v2271_v47 = vmul.f32 0.1, %v1473_v39  ;;  %v2526_v51 = vmax.f32 %v1470_v27, %v2270_v37 }
 0x1b0   :  { %v2399_v48 = vmul.f32 0.1, %v1985_v40  ;;  %v2269_v49 = vmul.f32 0.1, %v1465_v45  ;;  %v2654_v52 = vmax.f32 %v1982_v28, %v2398_v38  ;;  %v2524_v56 = vmax.f32 %v1462_v33, %v2268_v43 }
 0x1b1   :  { %v2397_v50 = vmul.f32 0.1, %v1977_v46  ;;  %v2527_v53 = vmax.f32 %v1473_v39, %v2271_v47  ;;  %v2652_v57 = vmax.f32 %v1974_v34, %v2396_v44 }
 0x1b2   :  { %v2655_v55 = vmax.f32 %v1985_v40, %v2399_v48  ;;  %v2525_v58 = vmax.f32 %v1465_v45, %v2269_v49  ;;  %v5652_v60 = vpop.f32.mrb[76].mxu0  ;;  %v5780_v61 = vpop.f32.mrb[76].mxu1 }
 0x1b3   :  { %v2653_v59 = vmax.f32 %v1977_v46, %v2397_v50  ;;  %v4843_v62 = vpack.c.bf16 %v2527_v53, %v2526_v51  ;;  %v1486_v0 = vadd.f32 %v6220_v54, %v5652_v60  ;;  %v1998_v1 = vadd.f32 %v6220_v54, %v5780_v61  ;;  %v1477_v2 = vpop.f32.mrb[77].mxu0  ;;  %v1989_v3 = vpop.f32.mrb[77].mxu1 }
 0x1b4   :  { %v5163_v63 = vpack.c.bf16 %v2655_v55, %v2654_v52  ;;  %v4838_v4 = vpack.c.bf16 %v2525_v58, %v2524_v56  ;;  %v1478_v6 = vadd.f32 %v6220_v54, %v1477_v2  ;;  %v1990_v7 = vadd.f32 %v6220_v54, %v1989_v3  ;;  %v5653_v8 = vpop.f32.mrb[78].mxu0  ;;  %v5781_v9 = vpop.f32.mrb[78].mxu1 }
 0x1b5   :  { %v5158_v5 = vpack.c.bf16 %v2653_v59, %v2652_v57  ;;  %5331 = vst [vmem:[#allocation7 + $0x128] sm:$0xff] %v4843_v62   ;;  %v2274_v10 = vmul.f32 0.1, %v1486_v0  ;;  %v2402_v11 = vmul.f32 0.1, %v1998_v1  ;;  %v1489_v12 = vadd.f32 %v6220_v54, %v5653_v8  ;;  %v1480_v14 = vpop.f32.mrb[79].mxu0 }
 0x1b6   :  { %5395 = vst [vmem:[#allocation7 + $0x328] sm:$0xff] %v5163_v63   ;;  %v2001_v13 = vadd.f32 %v6220_v54, %v5781_v9  ;;  %v1992_v15 = vpop.f32.mrb[79].mxu1  ;;  %5330 = vst [vmem:[#allocation7 + $0x120] sm:$0xff] %v4838_v4   ;;  %v2272_v16 = vmul.f32 0.1, %v1478_v6  ;;  %v1481_v18 = vadd.f32 %v6220_v54, %v1480_v14 }
 0x1b7   :  { %5394 = vst [vmem:[#allocation7 + $0x320] sm:$0xff] %v5158_v5   ;;  %v2400_v17 = vmul.f32 0.1, %v1990_v7  ;;  %v1993_v19 = vadd.f32 %v6220_v54, %v1992_v15  ;;  %v2275_v20 = vmul.f32 0.1, %v1489_v12  ;;  %v2530_v24 = vmax.f32 %v1486_v0, %v2274_v10 }
 0x1b8   :  { %v2403_v21 = vmul.f32 0.1, %v2001_v13  ;;  %v2273_v22 = vmul.f32 0.1, %v1481_v18  ;;  %v2658_v25 = vmax.f32 %v1998_v1, %v2402_v11  ;;  %v2528_v28 = vmax.f32 %v1478_v6, %v2272_v16 }
 0x1b9   :  { %v2401_v23 = vmul.f32 0.1, %v1993_v19  ;;  %v2531_v26 = vmax.f32 %v1489_v12, %v2275_v20  ;;  %v2656_v29 = vmax.f32 %v1990_v7, %v2400_v17 }
 0x1ba   :  { %v2659_v27 = vmax.f32 %v2001_v13, %v2403_v21  ;;  %v2529_v30 = vmax.f32 %v1481_v18, %v2273_v22  ;;  %v5656_v32 = vpop.f32.mrb[80].mxu0  ;;  %v5784_v33 = vpop.f32.mrb[80].mxu1 }
 0x1bb   :  { %v2657_v31 = vmax.f32 %v1993_v19, %v2401_v23  ;;  %v4853_v34 = vpack.c.bf16 %v2531_v26, %v2530_v24  ;;  %v1502_v36 = vadd.f32 %v6220_v54, %v5656_v32  ;;  %v2014_v37 = vadd.f32 %v6220_v54, %v5784_v33  ;;  %v1493_v38 = vpop.f32.mrb[81].mxu0  ;;  %v2005_v39 = vpop.f32.mrb[81].mxu1 }
 0x1bc   :  { %v5173_v35 = vpack.c.bf16 %v2659_v27, %v2658_v25  ;;  %v4848_v40 = vpack.c.bf16 %v2529_v30, %v2528_v28  ;;  %v1494_v42 = vadd.f32 %v6220_v54, %v1493_v38  ;;  %v2006_v43 = vadd.f32 %v6220_v54, %v2005_v39  ;;  %v5657_v44 = vpop.f32.mrb[82].mxu0  ;;  %v5785_v45 = vpop.f32.mrb[82].mxu1 }
 0x1bd   :  { %v5168_v41 = vpack.c.bf16 %v2657_v31, %v2656_v29  ;;  %5333 = vst [vmem:[#allocation7 + $0x138] sm:$0xff] %v4853_v34   ;;  %v2278_v46 = vmul.f32 0.1, %v1502_v36  ;;  %v2406_v47 = vmul.f32 0.1, %v2014_v37  ;;  %v1505_v48 = vadd.f32 %v6220_v54, %v5657_v44  ;;  %v1496_v50 = vpop.f32.mrb[83].mxu0 }
 0x1be   :  { %5397 = vst [vmem:[#allocation7 + $0x338] sm:$0xff] %v5173_v35   ;;  %v2017_v49 = vadd.f32 %v6220_v54, %v5785_v45  ;;  %v2008_v51 = vpop.f32.mrb[83].mxu1  ;;  %5332 = vst [vmem:[#allocation7 + $0x130] sm:$0xff] %v4848_v40   ;;  %v2276_v52 = vmul.f32 0.1, %v1494_v42  ;;  %v1497_v55 = vadd.f32 %v6220_v54, %v1496_v50 }
 0x1bf   :  { %5396 = vst [vmem:[#allocation7 + $0x330] sm:$0xff] %v5168_v41   ;;  %v2404_v53 = vmul.f32 0.1, %v2006_v43  ;;  %v2009_v56 = vadd.f32 %v6220_v54, %v2008_v51  ;;  %v2279_v57 = vmul.f32 0.1, %v1505_v48  ;;  %v2534_v61 = vmax.f32 %v1502_v36, %v2278_v46 }
 0x1c0   :  { %v2407_v58 = vmul.f32 0.1, %v2017_v49  ;;  %v2277_v59 = vmul.f32 0.1, %v1497_v55  ;;  %v2662_v62 = vmax.f32 %v2014_v37, %v2406_v47  ;;  %v2532_v1 = vmax.f32 %v1494_v42, %v2276_v52 }
 0x1c1   :  { %v2405_v60 = vmul.f32 0.1, %v2009_v56  ;;  %v2535_v63 = vmax.f32 %v1505_v48, %v2279_v57  ;;  %v2660_v2 = vmax.f32 %v2006_v43, %v2404_v53 }
 0x1c2   :  { %v2663_v0 = vmax.f32 %v2017_v49, %v2407_v58  ;;  %v2533_v3 = vmax.f32 %v1497_v55, %v2277_v59  ;;  %v5660_v5 = vpop.f32.mrb[84].mxu0  ;;  %v5788_v6 = vpop.f32.mrb[84].mxu1 }
 0x1c3   :  { %v2661_v4 = vmax.f32 %v2009_v56, %v2405_v60  ;;  %v4863_v7 = vpack.c.bf16 %v2535_v63, %v2534_v61  ;;  %v1518_v9 = vadd.f32 %v6220_v54, %v5660_v5  ;;  %v2030_v10 = vadd.f32 %v6220_v54, %v5788_v6  ;;  %v1509_v11 = vpop.f32.mrb[85].mxu0  ;;  %v2021_v12 = vpop.f32.mrb[85].mxu1 }
 0x1c4   :  { %v5183_v8 = vpack.c.bf16 %v2663_v0, %v2662_v62  ;;  %v4858_v13 = vpack.c.bf16 %v2533_v3, %v2532_v1  ;;  %v1510_v15 = vadd.f32 %v6220_v54, %v1509_v11  ;;  %v2022_v16 = vadd.f32 %v6220_v54, %v2021_v12  ;;  %v5661_v17 = vpop.f32.mrb[86].mxu0  ;;  %v5789_v18 = vpop.f32.mrb[86].mxu1 }
 0x1c5   :  { %v5178_v14 = vpack.c.bf16 %v2661_v4, %v2660_v2  ;;  %5335 = vst [vmem:[#allocation7 + $0x148] sm:$0xff] %v4863_v7   ;;  %v2282_v19 = vmul.f32 0.1, %v1518_v9  ;;  %v2410_v20 = vmul.f32 0.1, %v2030_v10  ;;  %v1521_v21 = vadd.f32 %v6220_v54, %v5661_v17  ;;  %v1512_v23 = vpop.f32.mrb[87].mxu0 }
 0x1c6   :  { %5399 = vst [vmem:[#allocation7 + $0x348] sm:$0xff] %v5183_v8   ;;  %v2033_v22 = vadd.f32 %v6220_v54, %v5789_v18  ;;  %v2024_v24 = vpop.f32.mrb[87].mxu1  ;;  %5334 = vst [vmem:[#allocation7 + $0x140] sm:$0xff] %v4858_v13   ;;  %v2280_v25 = vmul.f32 0.1, %v1510_v15  ;;  %v1513_v27 = vadd.f32 %v6220_v54, %v1512_v23 }
 0x1c7   :  { %5398 = vst [vmem:[#allocation7 + $0x340] sm:$0xff] %v5178_v14   ;;  %v2408_v26 = vmul.f32 0.1, %v2022_v16  ;;  %v2025_v28 = vadd.f32 %v6220_v54, %v2024_v24  ;;  %v2283_v29 = vmul.f32 0.1, %v1521_v21  ;;  %v2538_v33 = vmax.f32 %v1518_v9, %v2282_v19 }
 0x1c8   :  { %v2411_v30 = vmul.f32 0.1, %v2033_v22  ;;  %v2281_v31 = vmul.f32 0.1, %v1513_v27  ;;  %v2666_v34 = vmax.f32 %v2030_v10, %v2410_v20  ;;  %v2536_v37 = vmax.f32 %v1510_v15, %v2280_v25 }
 0x1c9   :  { %v2409_v32 = vmul.f32 0.1, %v2025_v28  ;;  %v2539_v35 = vmax.f32 %v1521_v21, %v2283_v29  ;;  %v2664_v38 = vmax.f32 %v2022_v16, %v2408_v26 }
 0x1ca   :  { %v2667_v36 = vmax.f32 %v2033_v22, %v2411_v30  ;;  %v2537_v39 = vmax.f32 %v1513_v27, %v2281_v31  ;;  %v5664_v41 = vpop.f32.mrb[88].mxu0  ;;  %v5792_v42 = vpop.f32.mrb[88].mxu1 }
 0x1cb   :  { %v2665_v40 = vmax.f32 %v2025_v28, %v2409_v32  ;;  %v4873_v43 = vpack.c.bf16 %v2539_v35, %v2538_v33  ;;  %v1534_v45 = vadd.f32 %v6220_v54, %v5664_v41  ;;  %v2046_v46 = vadd.f32 %v6220_v54, %v5792_v42  ;;  %v1525_v47 = vpop.f32.mrb[89].mxu0  ;;  %v2037_v48 = vpop.f32.mrb[89].mxu1 }
 0x1cc   :  { %v5193_v44 = vpack.c.bf16 %v2667_v36, %v2666_v34  ;;  %v4868_v49 = vpack.c.bf16 %v2537_v39, %v2536_v37  ;;  %v1526_v51 = vadd.f32 %v6220_v54, %v1525_v47  ;;  %v2038_v52 = vadd.f32 %v6220_v54, %v2037_v48  ;;  %v5665_v53 = vpop.f32.mrb[90].mxu0  ;;  %v5793_v55 = vpop.f32.mrb[90].mxu1 }
 0x1cd   :  { %v5188_v50 = vpack.c.bf16 %v2665_v40, %v2664_v38  ;;  %5337 = vst [vmem:[#allocation7 + $0x158] sm:$0xff] %v4873_v43   ;;  %v2286_v56 = vmul.f32 0.1, %v1534_v45  ;;  %v2414_v57 = vmul.f32 0.1, %v2046_v46  ;;  %v1537_v58 = vadd.f32 %v6220_v54, %v5665_v53  ;;  %v1528_v60 = vpop.f32.mrb[91].mxu0 }
 0x1ce   :  { %5401 = vst [vmem:[#allocation7 + $0x358] sm:$0xff] %v5193_v44   ;;  %v2049_v59 = vadd.f32 %v6220_v54, %v5793_v55  ;;  %v2040_v61 = vpop.f32.mrb[91].mxu1  ;;  %5336 = vst [vmem:[#allocation7 + $0x150] sm:$0xff] %v4868_v49   ;;  %v2284_v62 = vmul.f32 0.1, %v1526_v51  ;;  %v1529_v0 = vadd.f32 %v6220_v54, %v1528_v60 }
 0x1cf   :  { %5400 = vst [vmem:[#allocation7 + $0x350] sm:$0xff] %v5188_v50   ;;  %v2412_v63 = vmul.f32 0.1, %v2038_v52  ;;  %v2041_v1 = vadd.f32 %v6220_v54, %v2040_v61  ;;  %v2287_v2 = vmul.f32 0.1, %v1537_v58  ;;  %v2542_v6 = vmax.f32 %v1534_v45, %v2286_v56 }
 0x1d0   :  { %v2415_v3 = vmul.f32 0.1, %v2049_v59  ;;  %v2285_v4 = vmul.f32 0.1, %v1529_v0  ;;  %v2670_v7 = vmax.f32 %v2046_v46, %v2414_v57  ;;  %v2540_v10 = vmax.f32 %v1526_v51, %v2284_v62 }
 0x1d1   :  { %v2413_v5 = vmul.f32 0.1, %v2041_v1  ;;  %v2543_v8 = vmax.f32 %v1537_v58, %v2287_v2  ;;  %v2668_v11 = vmax.f32 %v2038_v52, %v2412_v63 }
 0x1d2   :  { %v2671_v9 = vmax.f32 %v2049_v59, %v2415_v3  ;;  %v2541_v12 = vmax.f32 %v1529_v0, %v2285_v4  ;;  %v5668_v14 = vpop.f32.mrb[92].mxu0  ;;  %v5796_v15 = vpop.f32.mrb[92].mxu1 }
 0x1d3   :  { %v2669_v13 = vmax.f32 %v2041_v1, %v2413_v5  ;;  %v4883_v16 = vpack.c.bf16 %v2543_v8, %v2542_v6  ;;  %v1550_v18 = vadd.f32 %v6220_v54, %v5668_v14  ;;  %v2062_v19 = vadd.f32 %v6220_v54, %v5796_v15  ;;  %v1541_v20 = vpop.f32.mrb[93].mxu0  ;;  %v2053_v21 = vpop.f32.mrb[93].mxu1 }
 0x1d4   :  { %v5203_v17 = vpack.c.bf16 %v2671_v9, %v2670_v7  ;;  %v4878_v22 = vpack.c.bf16 %v2541_v12, %v2540_v10  ;;  %v1542_v24 = vadd.f32 %v6220_v54, %v1541_v20  ;;  %v2054_v25 = vadd.f32 %v6220_v54, %v2053_v21  ;;  %v5669_v26 = vpop.f32.mrb[94].mxu0  ;;  %v5797_v27 = vpop.f32.mrb[94].mxu1 }
 0x1d5   :  { %v5198_v23 = vpack.c.bf16 %v2669_v13, %v2668_v11  ;;  %5339 = vst [vmem:[#allocation7 + $0x168] sm:$0xff] %v4883_v16   ;;  %v2290_v28 = vmul.f32 0.1, %v1550_v18  ;;  %v2418_v29 = vmul.f32 0.1, %v2062_v19  ;;  %v1553_v30 = vadd.f32 %v6220_v54, %v5669_v26  ;;  %v1544_v32 = vpop.f32.mrb[95].mxu0 }
 0x1d6   :  { %5403 = vst [vmem:[#allocation7 + $0x368] sm:$0xff] %v5203_v17   ;;  %v2065_v31 = vadd.f32 %v6220_v54, %v5797_v27  ;;  %v2056_v33 = vpop.f32.mrb[95].mxu1  ;;  %5338 = vst [vmem:[#allocation7 + $0x160] sm:$0xff] %v4878_v22   ;;  %v2288_v34 = vmul.f32 0.1, %v1542_v24  ;;  %v1545_v36 = vadd.f32 %v6220_v54, %v1544_v32 }
 0x1d7   :  { %5402 = vst [vmem:[#allocation7 + $0x360] sm:$0xff] %v5198_v23   ;;  %v2416_v35 = vmul.f32 0.1, %v2054_v25  ;;  %v2057_v37 = vadd.f32 %v6220_v54, %v2056_v33  ;;  %v2291_v38 = vmul.f32 0.1, %v1553_v30  ;;  %v2546_v42 = vmax.f32 %v1550_v18, %v2290_v28 }
 0x1d8   :  { %v2419_v39 = vmul.f32 0.1, %v2065_v31  ;;  %v2289_v40 = vmul.f32 0.1, %v1545_v36  ;;  %v2674_v43 = vmax.f32 %v2062_v19, %v2418_v29  ;;  %v2544_v46 = vmax.f32 %v1542_v24, %v2288_v34 }
 0x1d9   :  { %v2417_v41 = vmul.f32 0.1, %v2057_v37  ;;  %v2547_v44 = vmax.f32 %v1553_v30, %v2291_v38  ;;  %v2672_v47 = vmax.f32 %v2054_v25, %v2416_v35 }
 0x1da   :  { %v2675_v45 = vmax.f32 %v2065_v31, %v2419_v39  ;;  %v2545_v48 = vmax.f32 %v1545_v36, %v2289_v40  ;;  %v5672_v50 = vpop.f32.mrb[96].mxu0  ;;  %v5800_v51 = vpop.f32.mrb[96].mxu1 }
 0x1db   :  { %v2673_v49 = vmax.f32 %v2057_v37, %v2417_v41  ;;  %v4893_v52 = vpack.c.bf16 %v2547_v44, %v2546_v42  ;;  %v1566_v55 = vadd.f32 %v6220_v54, %v5672_v50  ;;  %v2078_v56 = vadd.f32 %v6220_v54, %v5800_v51  ;;  %v1557_v57 = vpop.f32.mrb[97].mxu0  ;;  %v2069_v58 = vpop.f32.mrb[97].mxu1 }
 0x1dc   :  { %v5213_v53 = vpack.c.bf16 %v2675_v45, %v2674_v43  ;;  %v4888_v59 = vpack.c.bf16 %v2545_v48, %v2544_v46  ;;  %v1558_v61 = vadd.f32 %v6220_v54, %v1557_v57  ;;  %v2070_v62 = vadd.f32 %v6220_v54, %v2069_v58  ;;  %v5673_v63 = vpop.f32.mrb[98].mxu0  ;;  %v5801_v0 = vpop.f32.mrb[98].mxu1 }
 0x1dd   :  { %v5208_v60 = vpack.c.bf16 %v2673_v49, %v2672_v47  ;;  %5341 = vst [vmem:[#allocation7 + $0x178] sm:$0xff] %v4893_v52   ;;  %v2294_v1 = vmul.f32 0.1, %v1566_v55  ;;  %v2422_v2 = vmul.f32 0.1, %v2078_v56  ;;  %v1569_v3 = vadd.f32 %v6220_v54, %v5673_v63  ;;  %v1560_v5 = vpop.f32.mrb[99].mxu0 }
 0x1de   :  { %5405 = vst [vmem:[#allocation7 + $0x378] sm:$0xff] %v5213_v53   ;;  %v2081_v4 = vadd.f32 %v6220_v54, %v5801_v0  ;;  %v2072_v6 = vpop.f32.mrb[99].mxu1  ;;  %5340 = vst [vmem:[#allocation7 + $0x170] sm:$0xff] %v4888_v59   ;;  %v2292_v7 = vmul.f32 0.1, %v1558_v61  ;;  %v1561_v9 = vadd.f32 %v6220_v54, %v1560_v5 }
 0x1df   :  { %5404 = vst [vmem:[#allocation7 + $0x370] sm:$0xff] %v5208_v60   ;;  %v2420_v8 = vmul.f32 0.1, %v2070_v62  ;;  %v2073_v10 = vadd.f32 %v6220_v54, %v2072_v6  ;;  %v2295_v11 = vmul.f32 0.1, %v1569_v3  ;;  %v2550_v15 = vmax.f32 %v1566_v55, %v2294_v1 }
 0x1e0   :  { %v2423_v12 = vmul.f32 0.1, %v2081_v4  ;;  %v2293_v13 = vmul.f32 0.1, %v1561_v9  ;;  %v2678_v16 = vmax.f32 %v2078_v56, %v2422_v2  ;;  %v2548_v19 = vmax.f32 %v1558_v61, %v2292_v7  ;;  %v6329_v54 = vld [vmem:[%s6404_s2] ss:$0 sm:$0xff] }
 0x1e1   :  { %v2421_v14 = vmul.f32 0.1, %v2073_v10  ;;  %v2551_v17 = vmax.f32 %v1569_v3, %v2295_v11  ;;  %v2676_v20 = vmax.f32 %v2070_v62, %v2420_v8  ;;  %s6065_s2 = smov [#allocation7]  }
 0x1e2   :  { %v2679_v18 = vmax.f32 %v2081_v4, %v2423_v12  ;;  %v2549_v21 = vmax.f32 %v1561_v9, %v2293_v13  ;;  %v5676_v23 = vpop.f32.mrb[100].mxu0  ;;  %v5804_v24 = vpop.f32.mrb[100].mxu1  ;;  %s3993_s15 = sshll.u32 %s6065_s2, 4  ;;  %s3994_s15 = int_to_ptr.vmem [resolvable:$true] %s3993_s15 }
 0x1e3   :  { %v2677_v22 = vmax.f32 %v2073_v10, %v2421_v14  ;;  %v4903_v25 = vpack.c.bf16 %v2551_v17, %v2550_v15  ;;  %v1582_v27 = vadd.f32 %v6329_v54, %v5676_v23  ;;  %v2094_v28 = vadd.f32 %v6329_v54, %v5804_v24  ;;  %v1573_v29 = vpop.f32.mrb[101].mxu0  ;;  %v2085_v30 = vpop.f32.mrb[101].mxu1  ;;  %s6033_s16 = scalar_lea.vmem %s3994_s15, 16384  ;;  %p6038_p3 = scmp.lt.s32.totalorder %s3994_s15, %s3994_s15 }
 0x1e4   :  { %v5223_v26 = vpack.c.bf16 %v2679_v18, %v2678_v16  ;;  %v4898_v31 = vpack.c.bf16 %v2549_v21, %v2548_v19  ;;  %v1574_v33 = vadd.f32 %v6329_v54, %v1573_v29  ;;  %v2086_v34 = vadd.f32 %v6329_v54, %v2085_v30  ;;  %v5677_v35 = vpop.f32.mrb[102].mxu0  ;;  %v5805_v36 = vpop.f32.mrb[102].mxu1  ;;  %p6034_p2 = scmp.ne.s32.totalorder %s3994_s15, %s6033_s16  ;;  %p6039_p4 = scmp.lt.s32.totalorder %s6033_s16, %s6033_s16 }
 0x1e5   :  { %v5218_v32 = vpack.c.bf16 %v2677_v22, %v2676_v20  ;;  %5343 = vst [vmem:[#allocation7 + $0x188] sm:$0xff] %v4903_v25   ;;  %v2298_v37 = vmul.f32 0.1, %v1582_v27  ;;  %v2426_v38 = vmul.f32 0.1, %v2094_v28  ;;  %v1585_v39 = vadd.f32 %v6329_v54, %v5677_v35  ;;  %v1576_v41 = vpop.f32.mrb[103].mxu0 }
 0x1e6   :  { %5407 = vst [vmem:[#allocation7 + $0x388] sm:$0xff] %v5223_v26   ;;  %v2097_v40 = vadd.f32 %v6329_v54, %v5805_v36  ;;  %v2088_v42 = vpop.f32.mrb[103].mxu1  ;;  %5342 = vst [vmem:[#allocation7 + $0x180] sm:$0xff] %v4898_v31   ;;  %v2296_v43 = vmul.f32 0.1, %v1574_v33  ;;  %v1577_v45 = vadd.f32 %v6329_v54, %v1576_v41  ;;  %p6040_p5 = por %p6039_p4, %p6038_p3 }
 0x1e7   :  { %5406 = vst [vmem:[#allocation7 + $0x380] sm:$0xff] %v5218_v32   ;;  %v2424_v44 = vmul.f32 0.1, %v2086_v34  ;;  %v2089_v46 = vadd.f32 %v6329_v54, %v2088_v42  ;;  %v2299_v47 = vmul.f32 0.1, %v1585_v39  ;;  %v2554_v51 = vmax.f32 %v1582_v27, %v2298_v37 }
 0x1e8   :  { %v2427_v48 = vmul.f32 0.1, %v2097_v40  ;;  %v2297_v49 = vmul.f32 0.1, %v1577_v45  ;;  %v2682_v52 = vmax.f32 %v2094_v28, %v2426_v38  ;;  %v2552_v56 = vmax.f32 %v1574_v33, %v2296_v43  ;;  %p6041_p6 = pnand %p6040_p5, %p6034_p2 }
 0x1e9   :  { %v2425_v50 = vmul.f32 0.1, %v2089_v46  ;;  %v2555_v53 = vmax.f32 %v1585_v39, %v2299_v47  ;;  %v2680_v57 = vmax.f32 %v2086_v34, %v2424_v44 }
 0x1ea   :  { %v2683_v55 = vmax.f32 %v2097_v40, %v2427_v48  ;;  %v2553_v58 = vmax.f32 %v1577_v45, %v2297_v49  ;;  %v5680_v60 = vpop.f32.mrb[104].mxu0  ;;  %v5808_v61 = vpop.f32.mrb[104].mxu1 }
 0x1eb   :  { %v2681_v59 = vmax.f32 %v2089_v46, %v2425_v50  ;;  %v4913_v62 = vpack.c.bf16 %v2555_v53, %v2554_v51  ;;  %v1598_v0 = vadd.f32 %v6329_v54, %v5680_v60  ;;  %v2110_v1 = vadd.f32 %v6329_v54, %v5808_v61  ;;  %v1589_v2 = vpop.f32.mrb[105].mxu0  ;;  %v2101_v3 = vpop.f32.mrb[105].mxu1 }
 0x1ec   :  { %v5233_v63 = vpack.c.bf16 %v2683_v55, %v2682_v52  ;;  %v4908_v4 = vpack.c.bf16 %v2553_v58, %v2552_v56  ;;  %v1590_v6 = vadd.f32 %v6329_v54, %v1589_v2  ;;  %v2102_v7 = vadd.f32 %v6329_v54, %v2101_v3  ;;  %v5681_v8 = vpop.f32.mrb[106].mxu0  ;;  %v5809_v9 = vpop.f32.mrb[106].mxu1 }
 0x1ed   :  { %v5228_v5 = vpack.c.bf16 %v2681_v59, %v2680_v57  ;;  %5345 = vst [vmem:[#allocation7 + $0x198] sm:$0xff] %v4913_v62   ;;  %v2302_v10 = vmul.f32 0.1, %v1598_v0  ;;  %v2430_v11 = vmul.f32 0.1, %v2110_v1  ;;  %v1601_v12 = vadd.f32 %v6329_v54, %v5681_v8  ;;  %v1592_v14 = vpop.f32.mrb[107].mxu0 }
 0x1ee   :  { %5409 = vst [vmem:[#allocation7 + $0x398] sm:$0xff] %v5233_v63   ;;  %v2113_v13 = vadd.f32 %v6329_v54, %v5809_v9  ;;  %v2104_v15 = vpop.f32.mrb[107].mxu1  ;;  %5344 = vst [vmem:[#allocation7 + $0x190] sm:$0xff] %v4908_v4   ;;  %v2300_v16 = vmul.f32 0.1, %v1590_v6  ;;  %v1593_v18 = vadd.f32 %v6329_v54, %v1592_v14 }
 0x1ef   :  { %5408 = vst [vmem:[#allocation7 + $0x390] sm:$0xff] %v5228_v5   ;;  %v2428_v17 = vmul.f32 0.1, %v2102_v7  ;;  %v2105_v19 = vadd.f32 %v6329_v54, %v2104_v15  ;;  %v2303_v20 = vmul.f32 0.1, %v1601_v12  ;;  %v2558_v24 = vmax.f32 %v1598_v0, %v2302_v10 }
 0x1f0   :  { %v2431_v21 = vmul.f32 0.1, %v2113_v13  ;;  %v2301_v22 = vmul.f32 0.1, %v1593_v18  ;;  %v2686_v25 = vmax.f32 %v2110_v1, %v2430_v11  ;;  %v2556_v28 = vmax.f32 %v1590_v6, %v2300_v16 }
 0x1f1   :  { %v2429_v23 = vmul.f32 0.1, %v2105_v19  ;;  %v2559_v26 = vmax.f32 %v1601_v12, %v2303_v20  ;;  %v2684_v29 = vmax.f32 %v2102_v7, %v2428_v17 }
 0x1f2   :  { %v2687_v27 = vmax.f32 %v2113_v13, %v2431_v21  ;;  %v2557_v30 = vmax.f32 %v1593_v18, %v2301_v22  ;;  %v5684_v32 = vpop.f32.mrb[108].mxu0  ;;  %v5812_v33 = vpop.f32.mrb[108].mxu1 }
 0x1f3   :  { %v2685_v31 = vmax.f32 %v2105_v19, %v2429_v23  ;;  %v4923_v34 = vpack.c.bf16 %v2559_v26, %v2558_v24  ;;  %v1614_v36 = vadd.f32 %v6329_v54, %v5684_v32  ;;  %v2126_v37 = vadd.f32 %v6329_v54, %v5812_v33  ;;  %v1605_v38 = vpop.f32.mrb[109].mxu0  ;;  %v2117_v39 = vpop.f32.mrb[109].mxu1 }
 0x1f4   :  { %v5243_v35 = vpack.c.bf16 %v2687_v27, %v2686_v25  ;;  %v4918_v40 = vpack.c.bf16 %v2557_v30, %v2556_v28  ;;  %v1606_v42 = vadd.f32 %v6329_v54, %v1605_v38  ;;  %v2118_v43 = vadd.f32 %v6329_v54, %v2117_v39  ;;  %v5685_v44 = vpop.f32.mrb[110].mxu0  ;;  %v5813_v45 = vpop.f32.mrb[110].mxu1 }
 0x1f5   :  { %v5238_v41 = vpack.c.bf16 %v2685_v31, %v2684_v29  ;;  %5347 = vst [vmem:[#allocation7 + $0x1a8] sm:$0xff] %v4923_v34   ;;  %v2306_v46 = vmul.f32 0.1, %v1614_v36  ;;  %v2434_v47 = vmul.f32 0.1, %v2126_v37  ;;  %v1617_v48 = vadd.f32 %v6329_v54, %v5685_v44  ;;  %v1608_v50 = vpop.f32.mrb[111].mxu0 }
 0x1f6   :  { %5411 = vst [vmem:[#allocation7 + $0x3a8] sm:$0xff] %v5243_v35   ;;  %v2129_v49 = vadd.f32 %v6329_v54, %v5813_v45  ;;  %v2120_v51 = vpop.f32.mrb[111].mxu1  ;;  %5346 = vst [vmem:[#allocation7 + $0x1a0] sm:$0xff] %v4918_v40   ;;  %v2304_v52 = vmul.f32 0.1, %v1606_v42  ;;  %v1609_v55 = vadd.f32 %v6329_v54, %v1608_v50 }
 0x1f7   :  { %5410 = vst [vmem:[#allocation7 + $0x3a0] sm:$0xff] %v5238_v41   ;;  %v2432_v53 = vmul.f32 0.1, %v2118_v43  ;;  %v2121_v56 = vadd.f32 %v6329_v54, %v2120_v51  ;;  %v2307_v57 = vmul.f32 0.1, %v1617_v48  ;;  %v2562_v61 = vmax.f32 %v1614_v36, %v2306_v46 }
 0x1f8   :  { %v2435_v58 = vmul.f32 0.1, %v2129_v49  ;;  %v2305_v59 = vmul.f32 0.1, %v1609_v55  ;;  %v2690_v62 = vmax.f32 %v2126_v37, %v2434_v47  ;;  %v2560_v1 = vmax.f32 %v1606_v42, %v2304_v52 }
 0x1f9   :  { %v2433_v60 = vmul.f32 0.1, %v2121_v56  ;;  %v2563_v63 = vmax.f32 %v1617_v48, %v2307_v57  ;;  %v2688_v2 = vmax.f32 %v2118_v43, %v2432_v53 }
 0x1fa   :  { %v2691_v0 = vmax.f32 %v2129_v49, %v2435_v58  ;;  %v2561_v3 = vmax.f32 %v1609_v55, %v2305_v59  ;;  %v5688_v5 = vpop.f32.mrb[112].mxu0  ;;  %v5816_v6 = vpop.f32.mrb[112].mxu1 }
 0x1fb   :  { %v2689_v4 = vmax.f32 %v2121_v56, %v2433_v60  ;;  %v4933_v7 = vpack.c.bf16 %v2563_v63, %v2562_v61  ;;  %v1630_v9 = vadd.f32 %v6329_v54, %v5688_v5  ;;  %v2142_v10 = vadd.f32 %v6329_v54, %v5816_v6  ;;  %v1621_v11 = vpop.f32.mrb[113].mxu0  ;;  %v2133_v12 = vpop.f32.mrb[113].mxu1 }
 0x1fc   :  { %v5253_v8 = vpack.c.bf16 %v2691_v0, %v2690_v62  ;;  %v4928_v13 = vpack.c.bf16 %v2561_v3, %v2560_v1  ;;  %v1622_v15 = vadd.f32 %v6329_v54, %v1621_v11  ;;  %v2134_v16 = vadd.f32 %v6329_v54, %v2133_v12  ;;  %v5689_v17 = vpop.f32.mrb[114].mxu0  ;;  %v5817_v18 = vpop.f32.mrb[114].mxu1 }
 0x1fd   :  { %v5248_v14 = vpack.c.bf16 %v2689_v4, %v2688_v2  ;;  %5349 = vst [vmem:[#allocation7 + $0x1b8] sm:$0xff] %v4933_v7   ;;  %v2310_v19 = vmul.f32 0.1, %v1630_v9  ;;  %v2438_v20 = vmul.f32 0.1, %v2142_v10  ;;  %v1633_v21 = vadd.f32 %v6329_v54, %v5689_v17  ;;  %v1624_v23 = vpop.f32.mrb[115].mxu0 }
 0x1fe   :  { %5413 = vst [vmem:[#allocation7 + $0x3b8] sm:$0xff] %v5253_v8   ;;  %v2145_v22 = vadd.f32 %v6329_v54, %v5817_v18  ;;  %v2136_v24 = vpop.f32.mrb[115].mxu1  ;;  %5348 = vst [vmem:[#allocation7 + $0x1b0] sm:$0xff] %v4928_v13   ;;  %v2308_v25 = vmul.f32 0.1, %v1622_v15  ;;  %v1625_v27 = vadd.f32 %v6329_v54, %v1624_v23 }
 0x1ff   :  { %5412 = vst [vmem:[#allocation7 + $0x3b0] sm:$0xff] %v5248_v14   ;;  %v2436_v26 = vmul.f32 0.1, %v2134_v16  ;;  %v2137_v28 = vadd.f32 %v6329_v54, %v2136_v24  ;;  %v2311_v29 = vmul.f32 0.1, %v1633_v21  ;;  %v2566_v33 = vmax.f32 %v1630_v9, %v2310_v19 }
 0x200   :  { %v2439_v30 = vmul.f32 0.1, %v2145_v22  ;;  %v2309_v31 = vmul.f32 0.1, %v1625_v27  ;;  %v2694_v34 = vmax.f32 %v2142_v10, %v2438_v20  ;;  %v2564_v37 = vmax.f32 %v1622_v15, %v2308_v25 }
 0x201   :  { %v2437_v32 = vmul.f32 0.1, %v2137_v28  ;;  %v2567_v35 = vmax.f32 %v1633_v21, %v2311_v29  ;;  %v2692_v38 = vmax.f32 %v2134_v16, %v2436_v26 }
 0x202   :  { %v2695_v36 = vmax.f32 %v2145_v22, %v2439_v30  ;;  %v2565_v39 = vmax.f32 %v1625_v27, %v2309_v31  ;;  %v5692_v41 = vpop.f32.mrb[116].mxu0  ;;  %v5820_v42 = vpop.f32.mrb[116].mxu1 }
 0x203   :  { %v2693_v40 = vmax.f32 %v2137_v28, %v2437_v32  ;;  %v4943_v43 = vpack.c.bf16 %v2567_v35, %v2566_v33  ;;  %v1646_v45 = vadd.f32 %v6329_v54, %v5692_v41  ;;  %v2158_v46 = vadd.f32 %v6329_v54, %v5820_v42  ;;  %v1637_v47 = vpop.f32.mrb[117].mxu0  ;;  %v2149_v48 = vpop.f32.mrb[117].mxu1 }
 0x204   :  { %v5263_v44 = vpack.c.bf16 %v2695_v36, %v2694_v34  ;;  %v4938_v49 = vpack.c.bf16 %v2565_v39, %v2564_v37  ;;  %v1638_v51 = vadd.f32 %v6329_v54, %v1637_v47  ;;  %v2150_v52 = vadd.f32 %v6329_v54, %v2149_v48  ;;  %v5693_v53 = vpop.f32.mrb[118].mxu0  ;;  %v5821_v55 = vpop.f32.mrb[118].mxu1 }
 0x205   :  { %v5258_v50 = vpack.c.bf16 %v2693_v40, %v2692_v38  ;;  %5351 = vst [vmem:[#allocation7 + $0x1c8] sm:$0xff] %v4943_v43   ;;  %v2314_v56 = vmul.f32 0.1, %v1646_v45  ;;  %v2442_v57 = vmul.f32 0.1, %v2158_v46  ;;  %v1649_v58 = vadd.f32 %v6329_v54, %v5693_v53  ;;  %v1640_v60 = vpop.f32.mrb[119].mxu0 }
 0x206   :  { %5415 = vst [vmem:[#allocation7 + $0x3c8] sm:$0xff] %v5263_v44   ;;  %v2161_v59 = vadd.f32 %v6329_v54, %v5821_v55  ;;  %v2152_v61 = vpop.f32.mrb[119].mxu1  ;;  %5350 = vst [vmem:[#allocation7 + $0x1c0] sm:$0xff] %v4938_v49   ;;  %v2312_v62 = vmul.f32 0.1, %v1638_v51  ;;  %v1641_v0 = vadd.f32 %v6329_v54, %v1640_v60 }
 0x207   :  { %5414 = vst [vmem:[#allocation7 + $0x3c0] sm:$0xff] %v5258_v50   ;;  %v2440_v63 = vmul.f32 0.1, %v2150_v52  ;;  %v2153_v1 = vadd.f32 %v6329_v54, %v2152_v61  ;;  %v2315_v2 = vmul.f32 0.1, %v1649_v58  ;;  %v2570_v6 = vmax.f32 %v1646_v45, %v2314_v56 }
 0x208   :  { %v2443_v3 = vmul.f32 0.1, %v2161_v59  ;;  %v2313_v4 = vmul.f32 0.1, %v1641_v0  ;;  %v2698_v7 = vmax.f32 %v2158_v46, %v2442_v57  ;;  %v2568_v10 = vmax.f32 %v1638_v51, %v2312_v62 }
 0x209   :  { %v2441_v5 = vmul.f32 0.1, %v2153_v1  ;;  %v2571_v8 = vmax.f32 %v1649_v58, %v2315_v2  ;;  %v2696_v11 = vmax.f32 %v2150_v52, %v2440_v63 }
 0x20a   :  { %v2699_v9 = vmax.f32 %v2161_v59, %v2443_v3  ;;  %v2569_v12 = vmax.f32 %v1641_v0, %v2313_v4  ;;  %v5696_v14 = vpop.f32.mrb[120].mxu0  ;;  %v5824_v15 = vpop.f32.mrb[120].mxu1 }
 0x20b   :  { %v2697_v13 = vmax.f32 %v2153_v1, %v2441_v5  ;;  %v4953_v16 = vpack.c.bf16 %v2571_v8, %v2570_v6  ;;  %v1662_v18 = vadd.f32 %v6329_v54, %v5696_v14  ;;  %v2174_v19 = vadd.f32 %v6329_v54, %v5824_v15  ;;  %v1653_v20 = vpop.f32.mrb[121].mxu0  ;;  %v2165_v21 = vpop.f32.mrb[121].mxu1 }
 0x20c   :  { %v5273_v17 = vpack.c.bf16 %v2699_v9, %v2698_v7  ;;  %v4948_v22 = vpack.c.bf16 %v2569_v12, %v2568_v10  ;;  %v1654_v24 = vadd.f32 %v6329_v54, %v1653_v20  ;;  %v2166_v25 = vadd.f32 %v6329_v54, %v2165_v21  ;;  %v5697_v26 = vpop.f32.mrb[122].mxu0  ;;  %v5825_v27 = vpop.f32.mrb[122].mxu1 }
 0x20d   :  { %v5268_v23 = vpack.c.bf16 %v2697_v13, %v2696_v11  ;;  %5353 = vst [vmem:[#allocation7 + $0x1d8] sm:$0xff] %v4953_v16   ;;  %v2318_v28 = vmul.f32 0.1, %v1662_v18  ;;  %v2446_v29 = vmul.f32 0.1, %v2174_v19  ;;  %v1665_v30 = vadd.f32 %v6329_v54, %v5697_v26  ;;  %v1656_v32 = vpop.f32.mrb[123].mxu0 }
 0x20e   :  { %5417 = vst [vmem:[#allocation7 + $0x3d8] sm:$0xff] %v5273_v17   ;;  %v2177_v31 = vadd.f32 %v6329_v54, %v5825_v27  ;;  %v2168_v33 = vpop.f32.mrb[123].mxu1  ;;  %5352 = vst [vmem:[#allocation7 + $0x1d0] sm:$0xff] %v4948_v22   ;;  %v2316_v34 = vmul.f32 0.1, %v1654_v24  ;;  %v1657_v36 = vadd.f32 %v6329_v54, %v1656_v32 }
 0x20f   :  { %5416 = vst [vmem:[#allocation7 + $0x3d0] sm:$0xff] %v5268_v23   ;;  %v2444_v35 = vmul.f32 0.1, %v2166_v25  ;;  %v2169_v37 = vadd.f32 %v6329_v54, %v2168_v33  ;;  %v2319_v38 = vmul.f32 0.1, %v1665_v30  ;;  %v2574_v42 = vmax.f32 %v1662_v18, %v2318_v28 }
 0x210   :  { %v2447_v39 = vmul.f32 0.1, %v2177_v31  ;;  %v2317_v40 = vmul.f32 0.1, %v1657_v36  ;;  %v2702_v43 = vmax.f32 %v2174_v19, %v2446_v29  ;;  %v2572_v46 = vmax.f32 %v1654_v24, %v2316_v34 }
 0x211   :  { %v2445_v41 = vmul.f32 0.1, %v2169_v37  ;;  %v2575_v44 = vmax.f32 %v1665_v30, %v2319_v38  ;;  %v2700_v47 = vmax.f32 %v2166_v25, %v2444_v35 }
 0x212   :  { %v2703_v45 = vmax.f32 %v2177_v31, %v2447_v39  ;;  %v2573_v48 = vmax.f32 %v1657_v36, %v2317_v40  ;;  %v5700_v50 = vpop.f32.mrb[124].mxu0  ;;  %v5828_v51 = vpop.f32.mrb[124].mxu1 }
 0x213   :  { %v2701_v49 = vmax.f32 %v2169_v37, %v2445_v41  ;;  %v4963_v52 = vpack.c.bf16 %v2575_v44, %v2574_v42  ;;  %v1678_v55 = vadd.f32 %v6329_v54, %v5700_v50  ;;  %v2190_v56 = vadd.f32 %v6329_v54, %v5828_v51  ;;  %v1669_v57 = vpop.f32.mrb[125].mxu0  ;;  %v2181_v58 = vpop.f32.mrb[125].mxu1 }
 0x214   :  { %v5283_v53 = vpack.c.bf16 %v2703_v45, %v2702_v43  ;;  %v4958_v59 = vpack.c.bf16 %v2573_v48, %v2572_v46  ;;  %v1670_v61 = vadd.f32 %v6329_v54, %v1669_v57  ;;  %v2182_v62 = vadd.f32 %v6329_v54, %v2181_v58  ;;  %v5701_v63 = vpop.f32.mrb[126].mxu0  ;;  %v5829_v0 = vpop.f32.mrb[126].mxu1 }
 0x215   :  { %v5278_v60 = vpack.c.bf16 %v2701_v49, %v2700_v47  ;;  %5355 = vst [vmem:[#allocation7 + $0x1e8] sm:$0xff] %v4963_v52   ;;  %v2322_v1 = vmul.f32 0.1, %v1678_v55  ;;  %v2450_v2 = vmul.f32 0.1, %v2190_v56  ;;  %v1681_v3 = vadd.f32 %v6329_v54, %v5701_v63  ;;  %v1672_v5 = vpop.f32.mrb[127].mxu0 }
 0x216   :  { %5419 = vst [vmem:[#allocation7 + $0x3e8] sm:$0xff] %v5283_v53   ;;  %v2193_v4 = vadd.f32 %v6329_v54, %v5829_v0  ;;  %v2184_v6 = vpop.f32.mrb[127].mxu1  ;;  %5354 = vst [vmem:[#allocation7 + $0x1e0] sm:$0xff] %v4958_v59   ;;  %v2320_v7 = vmul.f32 0.1, %v1670_v61  ;;  %v1673_v9 = vadd.f32 %v6329_v54, %v1672_v5 }
 0x217   :  { %5418 = vst [vmem:[#allocation7 + $0x3e0] sm:$0xff] %v5278_v60   ;;  %v2448_v8 = vmul.f32 0.1, %v2182_v62  ;;  %v2185_v10 = vadd.f32 %v6329_v54, %v2184_v6  ;;  %v2323_v11 = vmul.f32 0.1, %v1681_v3  ;;  %v2578_v15 = vmax.f32 %v1678_v55, %v2322_v1 }
 0x218   :  { %v2451_v12 = vmul.f32 0.1, %v2193_v4  ;;  %v2321_v13 = vmul.f32 0.1, %v1673_v9  ;;  %v2706_v16 = vmax.f32 %v2190_v56, %v2450_v2  ;;  %v2576_v19 = vmax.f32 %v1670_v61, %v2320_v7 }
 0x219   :  { %v2449_v14 = vmul.f32 0.1, %v2185_v10  ;;  %v2579_v17 = vmax.f32 %v1681_v3, %v2323_v11  ;;  %v2704_v20 = vmax.f32 %v2182_v62, %v2448_v8 }
 0x21a   :  { %v2707_v18 = vmax.f32 %v2193_v4, %v2451_v12  ;;  %v2577_v21 = vmax.f32 %v1673_v9, %v2321_v13 }
 0x21b   :  { %v2705_v22 = vmax.f32 %v2185_v10, %v2449_v14  ;;  %v4973_v23 = vpack.c.bf16 %v2579_v17, %v2578_v15 }
 0x21c   :  { %v5293_v24 = vpack.c.bf16 %v2707_v18, %v2706_v16  ;;  %v4968_v25 = vpack.c.bf16 %v2577_v21, %v2576_v19 }
 0x21d   :  { %v5288_v26 = vpack.c.bf16 %v2705_v22, %v2704_v20  ;;  %5357 = vst [vmem:[#allocation7 + $0x1f8] sm:$0xff] %v4973_v23  }
 0x21e   :  { %5421 = vst [vmem:[#allocation7 + $0x3f8] sm:$0xff] %v5293_v24   ;;  %5356 = vst [vmem:[#allocation7 + $0x1f0] sm:$0xff] %v4968_v25  }
 0x21f   :  { %5420 = vst [vmem:[#allocation7 + $0x3f0] sm:$0xff] %v5288_v26  }
 0x220   :  { %6044 = shalt.err (!%p6041_p6)
}
 0x221   :  { %s6045_s19 = scalar_lea.hbm %s6405_s3, 16384 }
 0x222   :  { %p6046_p7 = scmp.ne.s32.totalorder %s6405_s3, %s6045_s19  ;;  %p6049_p8 = scmp.lt.u32.totalorder %s6045_s19, %s6405_s3 }
 0x224   :  { %p6051_p9 = pnand %p6049_p8, %p6046_p7 }
 0x226   :  { %6054 = shalt.err (!%p6051_p9)
}
 0x227   :  { %3999 = dma.vmem_to_hbm [thread:$0]  %s3994_s15, 16384, %s6405_s3, [#allocation4], %s6062_s22, %s6062_s22, %s6063_s23  }
 0x228   :  { %6059 = dma.done.wait [#allocation4], 16384  }
 0x229   :  { %6060 = vsyncadd [#allocation4], 4294950912 }
 0x22a   :  { %4003 = vsyncpa [#allocation3], 1 }
 0x22b   :  { %4004 = vsyncpa [#allocation6], 1 }
 0x22c   :  { %4005 = vsyncpa [#allocation4], 1 }

</bundles_post_ra>
